<compile_context>
chip_gen: v7x
topology: tpu7x:2x2x1
jax: 0.10.0
libtpu: 0.0.40
codegen_flags: <defaults>
</compile_context>

<pallas_src>
import math

import jax
import jax.numpy as jnp
from jax.experimental import pallas as pl
from jax.experimental.pallas import tpu as pltpu

BN_EPS = 1e-5
VMEM_LIMIT = 48 * 1024 * 1024        # <= v7x's 64 MiB physical VMEM per core
ACC_MAX_ELEMS = 32 * 1024            # cap f32 accumulator at ~32 vregs
CONV1_CIN = 8                        # conv1 Cin zero-padded 3 -> 8
LANE = 128                           # minimum (lane-dense) channel width
SMALL_M = 256                        # N*OH*OW threshold for the im2col path


# ----------------------------- helpers -----------------------------

def _pad_c(c):
    """Activation / weight channel counts are padded to at least 128 lanes."""
    return max(c, LANE)


def _pick_tile_m(total, cap):
    """Largest divisor of `total` <= cap that is a multiple of 8.

    Falls back to the largest plain divisor <= cap, then to `total` (only hit
    for pathological shapes; current shapes always find a multiple-of-8 tile).
    """
    if total <= cap:
        return total
    best_any = None
    for t in range(cap, 0, -1):
        if total % t == 0:
            if t % 8 == 0:
                return t
            if best_any is None:
                best_any = t
    return best_any if best_any is not None else total


def _conv_phase_blocks(x, kh, kw, stride, pad):
    """KW-folded phase blocks for a kh x kw / stride-s conv.

    Returns (blocks, OH, OW, PHB, n_di) where blocks[di] has shape
    (N, PHB*OW, kw*C) and its row qi*OW + p (p = oh*OW + ow), column kj*C + c
    holds the padded-input pixel x_pad[n, oh*s + ki, ow*s + kj, c] for the tap
    ki = di + s*qi.  Extra bottom rows are never read by valid tiles.
    """
    N, H, W, C = x.shape
    OH = (H + 2 * pad - kh) // stride + 1
    OW = (W + 2 * pad - kw) // stride + 1
    n_di = min(stride, kh)
    PHB = OH + (kh - 1) // stride
    hp_need = (n_di - 1) + stride * (PHB - 1) + 1
    extra = max(0, hp_need - (H + 2 * pad))
    xp = jnp.pad(x, ((0, 0), (pad, pad + extra), (pad, pad), (0, 0)))
    blocks = []
    for di in range(n_di):
        taps = []
        for kj in range(kw):
            t = xp[:, di:di + stride * PHB:stride, kj:kj + stride * OW:stride, :]
            assert t.shape == (N, PHB, OW, C), t.shape
            taps.append(t)
        blk = jnp.concatenate(taps, axis=-1) if kw > 1 else taps[0]
        blocks.append(blk.reshape(N, PHB * OW, kw * C))
    return blocks, OH, OW, PHB, n_di


def _pool_phase_blocks(x, kh, kw, stride, pad, pad_value):
    """Per-tap phase blocks for max pooling (no K folding for a max reduce)."""
    N, H, W, C = x.shape
    OH = (H + 2 * pad - kh) // stride + 1
    OW = (W + 2 * pad - kw) // stride + 1
    n_di = min(stride, kh)
    PHB = OH + (kh - 1) // stride
    hp_need = (n_di - 1) + stride * (PHB - 1) + 1
    extra = max(0, hp_need - (H + 2 * pad))
    xp = jnp.pad(x, ((0, 0), (pad, pad + extra), (pad, pad), (0, 0)),
                 constant_values=pad_value)
    blocks = []
    for kj in range(kw):
        for di in range(n_di):
            t = xp[:, di:di + stride * PHB:stride, kj:kj + stride * OW:stride, :]
            assert t.shape == (N, PHB, OW, C), t.shape
            blocks.append(t.reshape(N, PHB * OW, C))
    return blocks, OH, OW, PHB, n_di


# ----------------------------- Pallas kernels -----------------------------

def _make_conv_kernel_phase(n_di, kh, stride, ow, tm, relu, has_res, has_ds):
    """Phase-window conv: KH chained MXU matmuls of K = KW*Cin into one f32
    accumulator; epilogue = +BN-shift (+fused 1x1 downsample) (+residual) (+ReLU)."""
    def kernel(*refs):
        i = 0
        b_refs = refs[i:i + n_di]; i += n_di        # each (PHB*OW, KW*Cin) bf16
        w_ref = refs[i]; i += 1                     # (KH, KW*Cin, tn) bf16
        sh_ref = refs[i]; i += 1                    # (1, tn) f32
        res_ref = None
        if has_res:
            res_ref = refs[i]; i += 1               # (tm, tn) bf16
        if has_ds:
            dsa_ref, dsw_ref, dssh_ref = refs[i:i + 3]; i += 3
        o_ref = refs[-1]                            # (tm, tn) bf16
        tn = o_ref.shape[-1]
        m0 = pl.multiple_of(pl.program_id(2) * tm, tm)
        acc = jnp.zeros((tm, tn), jnp.float32)
        for ki in range(kh):
            qi, di = ki // stride, ki % stride
            a = b_refs[di][pl.ds(qi * ow + m0, tm), :]
            acc = acc + jnp.dot(a, w_ref[ki], preferred_element_type=jnp.float32)
        acc = acc + sh_ref[...]                                  # folded-BN shift
        if has_ds:   # fused 1x1 downsample branch (the identity of the block)
            acc = acc + jnp.dot(dsa_ref[...], dsw_ref[...],
                                preferred_element_type=jnp.float32) + dssh_ref[...]
        if has_res:
            acc = acc + res_ref[...].astype(jnp.float32)
        if relu:
            acc = jnp.maximum(acc, 0.0)
        o_ref[...] = acc.astype(o_ref.dtype)
    return kernel


def _make_conv_kernel_flat(relu, has_res, has_ds):
    """Tiny-layer im2col conv: one K = KH*KW*Cin MXU matmul (+fused 1x1
    downsample matmul) (+residual) (+ReLU) in an f32 epilogue."""
    def kernel(*refs):
        i = 0
        a_ref = refs[i]; i += 1                     # (Mp, K) bf16
        w_ref = refs[i]; i += 1                     # (K, tn) bf16
        sh_ref = refs[i]; i += 1                    # (1, tn) f32
        res_ref = None
        if has_res:
            res_ref = refs[i]; i += 1
        if has_ds:
            dsa_ref, dsw_ref, dssh_ref = refs[i:i + 3]; i += 3
        o_ref = refs[-1]
        acc = jnp.dot(a_ref[...], w_ref[...], preferred_element_type=jnp.float32)
        acc = acc + sh_ref[...]
        if has_ds:
            acc = acc + jnp.dot(dsa_ref[...], dsw_ref[...],
                                preferred_element_type=jnp.float32) + dssh_ref[...]
        if has_res:
            acc = acc + res_ref[...].astype(jnp.float32)
        if relu:
            acc = jnp.maximum(acc, 0.0)
        o_ref[...] = acc.astype(o_ref.dtype)
    return kernel


def _make_pool_kernel(n_di, kh, kw, stride, ow, tm):
    def kernel(*refs):
        b_refs = refs[:-1]
        o_ref = refs[-1]
        m0 = pl.multiple_of(pl.program_id(1) * tm, tm)
        out = None
        for ki in range(kh):
            qi, di = ki // stride, ki % stride
            for kj in range(kw):
                a = b_refs[kj * n_di + di][pl.ds(qi * ow + m0, tm), :]
                out = a if out is None else jnp.maximum(out, a)
        o_ref[...] = out
    return kernel


def _head_kernel(x_ref, w_ref, b_ref, o_ref):
    # x_ref: (N, HW, C) -> adaptive avg pool over HW, then (N,C) @ (C,classes) + b
    pooled = jnp.mean(x_ref[...].astype(jnp.float32), axis=1)
    o_ref[...] = jnp.dot(pooled, w_ref[...],
                         preferred_element_type=jnp.float32) + b_ref[...]


# ----------------------------- Pallas wrappers -----------------------------

def conv_bn(x, conv, stride, pad, relu=True, residual=None,
            ds_x=None, ds_conv=None, ds_stride=1):
    """Conv2d(bias=False)+folded-BN (+fused 1x1 downsample identity | residual)
    (+ReLU).  x: (N,H,W,Cin) bf16 NHWC with Cin already lane-padded."""
    w = conv["w"]                        # (KH, KW*Cin, Cout) bf16, BN scale folded
    shift = conv["shift"]                # (1, Cout) f32
    kh, kw = conv["kh"], conv["kw"]
    N, H, W, cin = x.shape
    assert kw * cin == w.shape[1], (kw, cin, w.shape)
    cout = w.shape[-1]
    OH = (H + 2 * pad - kh) // stride + 1
    OW = (W + 2 * pad - kw) // stride + 1
    OHW = OH * OW
    has_res = residual is not None
    has_ds = ds_conv is not None

    if has_ds:   # 1x1/stride-s downsample reads a plain strided subsample of ds_x
        a_ds = ds_x[:, ::ds_stride, ::ds_stride, :]
        assert a_ds.shape[1:3] == (OH, OW), (a_ds.shape, OH, OW)
        cin_ds = a_ds.shape[-1]
        w_ds = ds_conv["w"].reshape(cin_ds, ds_conv["w"].shape[-1])
        sh_ds = ds_conv["shift"]

    # ---------------- Path B: tiny deep layers -> one-shot im2col matmul ----
    if N * OHW <= SMALL_M:
        K = kh * kw * cin
        xp = jnp.pad(x, ((0, 0), (pad, pad), (pad, pad), (0, 0)))
        cols = [xp[:, ki:ki + stride * OH:stride, kj:kj + stride * OW:stride, :]
                for ki in range(kh) for kj in range(kw)]
        A = jnp.concatenate(cols, axis=-1) if len(cols) > 1 else cols[0]
        M = N * OHW
        Mp = ((M + 7) // 8) * 8
        A = A.reshape(M, K)
        if Mp > M:
            A = jnp.pad(A, ((0, Mp - M), (0, 0)))
        tn = min(cout, 256)
        while Mp * tn > ACC_MAX_ELEMS and tn > LANE:   # keep acc <= ~32 vregs
            tn //= 2

        args = [A, w.reshape(K, cout), shift]
        in_specs = [pl.BlockSpec((Mp, K), lambda j: (0, 0)),
                    pl.BlockSpec((K, tn), lambda j: (0, j)),
                    pl.BlockSpec((1, tn), lambda j: (0, j))]
        if has_res:
            r = residual.reshape(M, cout)
            if Mp > M:
                r = jnp.pad(r, ((0, Mp - M), (0, 0)))
            args.append(r)
            in_specs.append(pl.BlockSpec((Mp, tn), lambda j: (0, j)))
        if has_ds:
            a_ds_flat = a_ds.reshape(M, cin_ds)
            if Mp > M:
                a_ds_flat = jnp.pad(a_ds_flat, ((0, Mp - M), (0, 0)))
            args += [a_ds_flat, w_ds, sh_ds]
            in_specs += [pl.BlockSpec((Mp, cin_ds), lambda j: (0, 0)),
                         pl.BlockSpec((cin_ds, tn), lambda j: (0, j)),
                         pl.BlockSpec((1, tn), lambda j: (0, j))]

        out = pl.pallas_call(
            _make_conv_kernel_flat(relu, has_res, has_ds),
            out_shape=jax.ShapeDtypeStruct((Mp, cout), jnp.bfloat16),
            grid=(cout // tn,),
            in_specs=in_specs,
            out_specs=pl.BlockSpec((Mp, tn), lambda j: (0, j)),
            compiler_params=pltpu.CompilerParams(
                dimension_semantics=("parallel",),
                vmem_limit_bytes=VMEM_LIMIT,
            ),
        )(*args)
        return out[:M].reshape(N, OH, OW, cout)

    # ---------------- Path A: phase-window blocks, KW folded into K ---------
    blocks, OH, OW, PHB, n_di = _conv_phase_blocks(x, kh, kw, stride, pad)
    tn = min(cout, 256)
    tm = _pick_tile_m(OHW, max(8, ACC_MAX_ELEMS // tn))

    args = list(blocks) + [w, shift]
    in_specs = [pl.BlockSpec((None, PHB * OW, kw * cin), lambda j, b, mi: (b, 0, 0))
                for _ in blocks]
    in_specs += [pl.BlockSpec((kh, kw * cin, tn), lambda j, b, mi: (0, 0, j)),
                 pl.BlockSpec((1, tn), lambda j, b, mi: (0, j))]
    if has_res:
        args.append(residual.reshape(N, OHW, cout))
        in_specs.append(pl.BlockSpec((None, tm, tn), lambda j, b, mi: (b, mi, j)))
    if has_ds:
        args += [a_ds.reshape(N, OHW, cin_ds), w_ds, sh_ds]
        in_specs += [pl.BlockSpec((None, tm, cin_ds), lambda j, b, mi: (b, mi, 0)),
                     pl.BlockSpec((cin_ds, tn), lambda j, b, mi: (0, j)),
                     pl.BlockSpec((1, tn), lambda j, b, mi: (0, j))]

    out = pl.pallas_call(
        _make_conv_kernel_phase(n_di, kh, stride, OW, tm, relu, has_res, has_ds),
        out_shape=jax.ShapeDtypeStruct((N, OHW, cout), jnp.bfloat16),
        grid=(cout // tn, N, OHW // tm),
        in_specs=in_specs,
        out_specs=pl.BlockSpec((None, tm, tn), lambda j, b, mi: (b, mi, j)),
        compiler_params=pltpu.CompilerParams(
            dimension_semantics=("parallel", "parallel", "parallel"),
            vmem_limit_bytes=VMEM_LIMIT,
        ),
    )(*args)
    return out.reshape(N, OH, OW, cout)


def maxpool_3x3_s2_p1(x):
    """nn.MaxPool2d(kernel_size=3, stride=2, padding=1) in NHWC, tiled over M."""
    N, H, W, C = x.shape
    blocks, OH, OW, PHB, n_di = _pool_phase_blocks(x, 3, 3, 2, 1, -jnp.inf)
    OHW = OH * OW
    tm = _pick_tile_m(OHW, 2048)
    out = pl.pallas_call(
        _make_pool_kernel(n_di, 3, 3, 2, OW, tm),
        out_shape=jax.ShapeDtypeStruct((N, OHW, C), x.dtype),
        grid=(N, OHW // tm),
        in_specs=[pl.BlockSpec((None, PHB * OW, C), lambda b, mi: (b, 0, 0))
                  for _ in blocks],
        out_specs=pl.BlockSpec((None, tm, C), lambda b, mi: (b, mi, 0)),
        compiler_params=pltpu.CompilerParams(
            dimension_semantics=("parallel", "parallel"),
            vmem_limit_bytes=VMEM_LIMIT,
        ),
    )(*blocks)
    return out.reshape(N, OH, OW, C)


def head(x, fc_w_t, fc_b):
    """AdaptiveAvgPool2d((1,1)) + flatten + Linear, fused in one Pallas kernel."""
    N, H, W, C = x.shape
    return pl.pallas_call(
        _head_kernel,
        out_shape=jax.ShapeDtypeStruct((N, fc_w_t.shape[1]), jnp.float32),
    )(x.reshape(N, H * W, C), fc_w_t, fc_b)


# ----------------------------- parameters -----------------------------

def _kaiming_conv(key, cout, cin, kh, kw):
    # nn.init.kaiming_normal_(mode='fan_out', nonlinearity='relu')
    fan_out = cout * kh * kw
    std = math.sqrt(2.0 / fan_out)
    return std * jax.random.normal(key, (cout, cin, kh, kw), jnp.float32)


def _bn_default(c):
    # gamma=1, beta=0, running_mean=0, running_var=1 -> (scale, shift)
    scale = jnp.full((c,), 1.0 / math.sqrt(1.0 + BN_EPS), jnp.float32)
    shift = jnp.zeros((c,), jnp.float32)
    return scale, shift


def _prep_conv(w, bn, cin_to=None, cout_to=None):
    """Fold BN scale into weights, zero-pad channels, store (KH, KW*Cin, Cout) bf16."""
    cout, cin, kh, kw = w.shape
    scale, shift = bn
    w = w * scale.reshape(cout, 1, 1, 1)
    if cin_to is not None and cin_to > cin:
        w = jnp.pad(w, ((0, 0), (0, cin_to - cin), (0, 0), (0, 0)))
        cin = cin_to
    if cout_to is not None and cout_to > cout:
        w = jnp.pad(w, ((0, cout_to - cout), (0, 0), (0, 0), (0, 0)))
        shift = jnp.pad(shift, (0, cout_to - cout))
        cout = cout_to
    w_mat = jnp.transpose(w, (2, 3, 1, 0)).reshape(kh, kw * cin, cout)
    return {"w": w_mat.astype(jnp.bfloat16),
            "shift": shift.reshape(1, cout).astype(jnp.float32),
            "kh": kh, "kw": kw, "cin": cin, "cout": cout}


def init_params(key, blocks_num, num_classes=3):
    keys = iter(jax.random.split(key, 64))
    params = {}
    w1 = _kaiming_conv(next(keys), 64, 3, 7, 7)
    params["conv1"] = _prep_conv(w1, _bn_default(64),
                                 cin_to=CONV1_CIN, cout_to=_pad_c(64))

    in_ch = 64
    layers = []
    for li, (ch, nb) in enumerate(zip((64, 128, 256, 512), blocks_num)):
        layer_stride = 1 if li == 0 else 2
        blocks = []
        for bi in range(nb):
            s = layer_stride if bi == 0 else 1
            blk = {"stride": s}
            blk["c1"] = _prep_conv(_kaiming_conv(next(keys), ch, in_ch, 3, 3),
                                   _bn_default(ch),
                                   cin_to=_pad_c(in_ch), cout_to=_pad_c(ch))
            blk["c2"] = _prep_conv(_kaiming_conv(next(keys), ch, ch, 3, 3),
                                   _bn_default(ch),
                                   cin_to=_pad_c(ch), cout_to=_pad_c(ch))
            if s != 1 or in_ch != ch:       # BasicBlock.expansion == 1
                blk["ds"] = _prep_conv(_kaiming_conv(next(keys), ch, in_ch, 1, 1),
                                       _bn_default(ch),
                                       cin_to=_pad_c(in_ch), cout_to=_pad_c(ch))
            else:
                blk["ds"] = None
            blocks.append(blk)
            in_ch = ch
        layers.append(blocks)
    params["layers"] = layers
    params["feat_ch"] = in_ch

    bound = 1.0 / math.sqrt(512)
    fc_w = jax.random.uniform(next(keys), (num_classes, 512), jnp.float32,
                              -bound, bound)
    fc_b = jax.random.uniform(next(keys), (num_classes,), jnp.float32,
                              -bound, bound)
    params["fc_w_t"] = jnp.transpose(fc_w)
    params["fc_b"] = fc_b.reshape(1, num_classes)
    return params


# ----------------------------- forward pass -----------------------------

def basic_block(x, blk):
    s = blk["stride"]
    out1 = conv_bn(x, blk["c1"], stride=s, pad=1, relu=True)
    if blk["ds"] is not None:
        # conv2 + BN + (fused 1x1-downsample identity) + ReLU in ONE pallas_call
        return conv_bn(out1, blk["c2"], stride=1, pad=1, relu=True,
                       ds_x=x, ds_conv=blk["ds"], ds_stride=s)
    # conv2 + BN + residual(x) + ReLU
    return conv_bn(out1, blk["c2"], stride=1, pad=1, relu=True, residual=x)


def resnet_forward(x_nchw, params, include_top=True):
    x = jnp.transpose(x_nchw, (0, 2, 3, 1)).astype(jnp.bfloat16)   # NCHW -> NHWC
    pad_c = params["conv1"]["cin"] - x.shape[-1]
    if pad_c > 0:   # zero-pad input channels to match zero-padded conv1 weights
        x = jnp.pad(x, ((0, 0), (0, 0), (0, 0), (0, pad_c)))
    x = conv_bn(x, params["conv1"], stride=2, pad=3, relu=True)
    x = maxpool_3x3_s2_p1(x)
    for layer in params["layers"]:
        for blk in layer:
            x = basic_block(x, blk)
    if include_top:
        return head(x, params["fc_w_t"], params["fc_b"])
    x = x[..., :params["feat_ch"]]                 # drop lane padding (no-op here)
    return jnp.transpose(x.astype(jnp.float32), (0, 3, 1, 2))      # back to NCHW


# ----------------------------- main -----------------------------

if __name__ == "__main__":
    key = jax.random.PRNGKey(0)
    pkey, xkey = jax.random.split(key)

    params = init_params(pkey, blocks_num=[1, 1, 1, 1], num_classes=3)

    # Input: NCHW, 3 channels, 64x64 spatial (survives the 5 stride-2 stages -> 2x2).
    x = jax.random.normal(xkey, (2, 3, 64, 64), jnp.float32)

    logits = resnet_forward(x, params, include_top=True)
    logits = jax.block_until_ready(logits)
    assert logits.shape == (2, 3) and logits.dtype == jnp.float32
    print("KERNEL_OK")
</pallas_src>

<mosaic_0001>
module attributes {stable_mosaic.version = 11 : i64} {
  func.func @kernel(%arg0: i32, %arg1: i32, %arg2: i32, %arg3: memref<1x1120x56xbf16, #tpu.memory_space<vmem>>, %arg4: memref<1x1120x56xbf16, #tpu.memory_space<vmem>>, %arg5: memref<7x56x128xbf16, #tpu.memory_space<vmem>>, %arg6: memref<1x128xf32, #tpu.memory_space<vmem>>, %arg7: memref<1x256x128xbf16, #tpu.memory_space<vmem>>) attributes {dimension_semantics = [#tpu.dimension_semantics<parallel>, #tpu.dimension_semantics<parallel>, #tpu.dimension_semantics<parallel>], iteration_bounds = array<i64: 1, 2, 4>, scalar_prefetch = 0 : i64, scratch_operands = 0 : i64, tpu.core_type = #tpu.core_type<tc>, window_params = [{transform_indices = @transform_0, window_bounds = array<i64: 1, 1120, 56>}, {transform_indices = @transform_1, window_bounds = array<i64: 1, 1120, 56>}, {transform_indices = @transform_2, window_bounds = array<i64: 7, 56, 128>}, {transform_indices = @transform_3, window_bounds = array<i64: 1, 128>}, {transform_indices = @transform_4, window_bounds = array<i64: 1, 256, 128>}]} {
    %c256_i32 = arith.constant 256 : i32
    %0 = arith.muli %arg2, %c256_i32 : i32
    %1 = tpu.assume_multiple %0, 256 : i32
    %cst = arith.constant 0.000000e+00 : f32
    %2 = vector.broadcast %cst : f32 to vector<256x128xf32>
    %c0_i32 = arith.constant 0 : i32
    %3 = arith.addi %c0_i32, %1 : i32
    %c0 = arith.constant 0 : index
    %4 = arith.index_cast %3 : i32 to index
    %c0_0 = arith.constant 0 : index
    %5 = vector.load %arg3[%c0, %4, %c0_0] : memref<1x1120x56xbf16, #tpu.memory_space<vmem>>, vector<1x256x56xbf16>
    %6 = vector.shape_cast %5 : vector<1x256x56xbf16> to vector<256x56xbf16>
    %c0_1 = arith.constant 0 : index
    %c0_2 = arith.constant 0 : index
    %c0_3 = arith.constant 0 : index
    %7 = vector.load %arg5[%c0_1, %c0_2, %c0_3] : memref<7x56x128xbf16, #tpu.memory_space<vmem>>, vector<1x56x128xbf16>
    %8 = vector.shape_cast %7 : vector<1x56x128xbf16> to vector<56x128xbf16>
    %cst_4 = arith.constant dense<0.000000e+00> : vector<256x128xf32>
    %9 = tpu.matmul %6, %8, %cst_4 {dimension_numbers = #tpu.dot_dimension_numbers<[1], [0], [0], [1], [0, 0, 1, 1], [], []>} : vector<256x56xbf16>, vector<56x128xbf16>, vector<256x128xf32> -> vector<256x128xf32>
    %10 = arith.addf %2, %9 : vector<256x128xf32>
    %c0_i32_5 = arith.constant 0 : i32
    %11 = arith.addi %c0_i32_5, %1 : i32
    %c0_6 = arith.constant 0 : index
    %12 = arith.index_cast %11 : i32 to index
    %c0_7 = arith.constant 0 : index
    %13 = vector.load %arg4[%c0_6, %12, %c0_7] : memref<1x1120x56xbf16, #tpu.memory_space<vmem>>, vector<1x256x56xbf16>
    %14 = vector.shape_cast %13 : vector<1x256x56xbf16> to vector<256x56xbf16>
    %c1 = arith.constant 1 : index
    %c0_8 = arith.constant 0 : index
    %c0_9 = arith.constant 0 : index
    %15 = vector.load %arg5[%c1, %c0_8, %c0_9] : memref<7x56x128xbf16, #tpu.memory_space<vmem>>, vector<1x56x128xbf16>
    %16 = vector.shape_cast %15 : vector<1x56x128xbf16> to vector<56x128xbf16>
    %cst_10 = arith.constant dense<0.000000e+00> : vector<256x128xf32>
    %17 = tpu.matmul %14, %16, %cst_10 {dimension_numbers = #tpu.dot_dimension_numbers<[1], [0], [0], [1], [0, 0, 1, 1], [], []>} : vector<256x56xbf16>, vector<56x128xbf16>, vector<256x128xf32> -> vector<256x128xf32>
    %18 = arith.addf %10, %17 : vector<256x128xf32>
    %c32_i32 = arith.constant 32 : i32
    %19 = arith.addi %c32_i32, %1 : i32
    %c0_11 = arith.constant 0 : index
    %20 = arith.index_cast %19 : i32 to index
    %c0_12 = arith.constant 0 : index
    %21 = vector.load %arg3[%c0_11, %20, %c0_12] : memref<1x1120x56xbf16, #tpu.memory_space<vmem>>, vector<1x256x56xbf16>
    %22 = vector.shape_cast %21 : vector<1x256x56xbf16> to vector<256x56xbf16>
    %c2 = arith.constant 2 : index
    %c0_13 = arith.constant 0 : index
    %c0_14 = arith.constant 0 : index
    %23 = vector.load %arg5[%c2, %c0_13, %c0_14] : memref<7x56x128xbf16, #tpu.memory_space<vmem>>, vector<1x56x128xbf16>
    %24 = vector.shape_cast %23 : vector<1x56x128xbf16> to vector<56x128xbf16>
    %cst_15 = arith.constant dense<0.000000e+00> : vector<256x128xf32>
    %25 = tpu.matmul %22, %24, %cst_15 {dimension_numbers = #tpu.dot_dimension_numbers<[1], [0], [0], [1], [0, 0, 1, 1], [], []>} : vector<256x56xbf16>, vector<56x128xbf16>, vector<256x128xf32> -> vector<256x128xf32>
    %26 = arith.addf %18, %25 : vector<256x128xf32>
    %c32_i32_16 = arith.constant 32 : i32
    %27 = arith.addi %c32_i32_16, %1 : i32
    %c0_17 = arith.constant 0 : index
    %28 = arith.index_cast %27 : i32 to index
    %c0_18 = arith.constant 0 : index
    %29 = vector.load %arg4[%c0_17, %28, %c0_18] : memref<1x1120x56xbf16, #tpu.memory_space<vmem>>, vector<1x256x56xbf16>
    %30 = vector.shape_cast %29 : vector<1x256x56xbf16> to vector<256x56xbf16>
    %c3 = arith.constant 3 : index
    %c0_19 = arith.constant 0 : index
    %c0_20 = arith.constant 0 : index
    %31 = vector.load %arg5[%c3, %c0_19, %c0_20] : memref<7x56x128xbf16, #tpu.memory_space<vmem>>, vector<1x56x128xbf16>
    %32 = vector.shape_cast %31 : vector<1x56x128xbf16> to vector<56x128xbf16>
    %cst_21 = arith.constant dense<0.000000e+00> : vector<256x128xf32>
    %33 = tpu.matmul %30, %32, %cst_21 {dimension_numbers = #tpu.dot_dimension_numbers<[1], [0], [0], [1], [0, 0, 1, 1], [], []>} : vector<256x56xbf16>, vector<56x128xbf16>, vector<256x128xf32> -> vector<256x128xf32>
    %34 = arith.addf %26, %33 : vector<256x128xf32>
    %c64_i32 = arith.constant 64 : i32
    %35 = arith.addi %c64_i32, %1 : i32
    %c0_22 = arith.constant 0 : index
    %36 = arith.index_cast %35 : i32 to index
    %c0_23 = arith.constant 0 : index
    %37 = vector.load %arg3[%c0_22, %36, %c0_23] : memref<1x1120x56xbf16, #tpu.memory_space<vmem>>, vector<1x256x56xbf16>
    %38 = vector.shape_cast %37 : vector<1x256x56xbf16> to vector<256x56xbf16>
    %c4 = arith.constant 4 : index
    %c0_24 = arith.constant 0 : index
    %c0_25 = arith.constant 0 : index
    %39 = vector.load %arg5[%c4, %c0_24, %c0_25] : memref<7x56x128xbf16, #tpu.memory_space<vmem>>, vector<1x56x128xbf16>
    %40 = vector.shape_cast %39 : vector<1x56x128xbf16> to vector<56x128xbf16>
    %cst_26 = arith.constant dense<0.000000e+00> : vector<256x128xf32>
    %41 = tpu.matmul %38, %40, %cst_26 {dimension_numbers = #tpu.dot_dimension_numbers<[1], [0], [0], [1], [0, 0, 1, 1], [], []>} : vector<256x56xbf16>, vector<56x128xbf16>, vector<256x128xf32> -> vector<256x128xf32>
    %42 = arith.addf %34, %41 : vector<256x128xf32>
    %c64_i32_27 = arith.constant 64 : i32
    %43 = arith.addi %c64_i32_27, %1 : i32
    %c0_28 = arith.constant 0 : index
    %44 = arith.index_cast %43 : i32 to index
    %c0_29 = arith.constant 0 : index
    %45 = vector.load %arg4[%c0_28, %44, %c0_29] : memref<1x1120x56xbf16, #tpu.memory_space<vmem>>, vector<1x256x56xbf16>
    %46 = vector.shape_cast %45 : vector<1x256x56xbf16> to vector<256x56xbf16>
    %c5 = arith.constant 5 : index
    %c0_30 = arith.constant 0 : index
    %c0_31 = arith.constant 0 : index
    %47 = vector.load %arg5[%c5, %c0_30, %c0_31] : memref<7x56x128xbf16, #tpu.memory_space<vmem>>, vector<1x56x128xbf16>
    %48 = vector.shape_cast %47 : vector<1x56x128xbf16> to vector<56x128xbf16>
    %cst_32 = arith.constant dense<0.000000e+00> : vector<256x128xf32>
    %49 = tpu.matmul %46, %48, %cst_32 {dimension_numbers = #tpu.dot_dimension_numbers<[1], [0], [0], [1], [0, 0, 1, 1], [], []>} : vector<256x56xbf16>, vector<56x128xbf16>, vector<256x128xf32> -> vector<256x128xf32>
    %50 = arith.addf %42, %49 : vector<256x128xf32>
    %c96_i32 = arith.constant 96 : i32
    %51 = arith.addi %c96_i32, %1 : i32
    %c0_33 = arith.constant 0 : index
    %52 = arith.index_cast %51 : i32 to index
    %c0_34 = arith.constant 0 : index
    %53 = vector.load %arg3[%c0_33, %52, %c0_34] : memref<1x1120x56xbf16, #tpu.memory_space<vmem>>, vector<1x256x56xbf16>
    %54 = vector.shape_cast %53 : vector<1x256x56xbf16> to vector<256x56xbf16>
    %c6 = arith.constant 6 : index
    %c0_35 = arith.constant 0 : index
    %c0_36 = arith.constant 0 : index
    %55 = vector.load %arg5[%c6, %c0_35, %c0_36] : memref<7x56x128xbf16, #tpu.memory_space<vmem>>, vector<1x56x128xbf16>
    %56 = vector.shape_cast %55 : vector<1x56x128xbf16> to vector<56x128xbf16>
    %cst_37 = arith.constant dense<0.000000e+00> : vector<256x128xf32>
    %57 = tpu.matmul %54, %56, %cst_37 {dimension_numbers = #tpu.dot_dimension_numbers<[1], [0], [0], [1], [0, 0, 1, 1], [], []>} : vector<256x56xbf16>, vector<56x128xbf16>, vector<256x128xf32> -> vector<256x128xf32>
    %58 = arith.addf %50, %57 : vector<256x128xf32>
    %c0_38 = arith.constant 0 : index
    %c0_39 = arith.constant 0 : index
    %59 = vector.load %arg6[%c0_38, %c0_39] : memref<1x128xf32, #tpu.memory_space<vmem>>, vector<1x128xf32>
    %60 = vector.broadcast %59 : vector<1x128xf32> to vector<256x128xf32>
    %61 = arith.addf %58, %60 : vector<256x128xf32>
    %cst_40 = arith.constant 0.000000e+00 : f32
    %62 = vector.broadcast %cst_40 : f32 to vector<256x128xf32>
    %63 = arith.maximumf %61, %62 : vector<256x128xf32>
    %64 = arith.truncf %63 : vector<256x128xf32> to vector<256x128xbf16>
    %c0_41 = arith.constant 0 : index
    %c0_42 = arith.constant 0 : index
    %c0_43 = arith.constant 0 : index
    %65 = vector.load %arg7[%c0_41, %c0_42, %c0_43] : memref<1x256x128xbf16, #tpu.memory_space<vmem>>, vector<1x256x128xbf16>
    %66 = vector.shape_cast %65 : vector<1x256x128xbf16> to vector<256x128xbf16>
    %67 = vector.shape_cast %64 : vector<256x128xbf16> to vector<1x256x128xbf16>
    tpu.vector_store %arg7[%c0_41, %c0_42, %c0_43], %67 {strides = array<i32>} : memref<1x256x128xbf16, #tpu.memory_space<vmem>>, vector<1x256x128xbf16>,
    return
  }
  func.func @transform_0(%arg0: i32, %arg1: i32, %arg2: i32) -> (i32, i32, i32) {
    %c0_i32 = arith.constant 0 : i32
    %c0_i32_0 = arith.constant 0 : i32
    %c0_i32_1 = arith.constant 0 : i32
    return %arg1, %c0_i32, %c0_i32_0 : i32, i32, i32
  }
  func.func @transform_1(%arg0: i32, %arg1: i32, %arg2: i32) -> (i32, i32, i32) {
    %c0_i32 = arith.constant 0 : i32
    %c0_i32_0 = arith.constant 0 : i32
    %c0_i32_1 = arith.constant 0 : i32
    return %arg1, %c0_i32, %c0_i32_0 : i32, i32, i32
  }
  func.func @transform_2(%arg0: i32, %arg1: i32, %arg2: i32) -> (i32, i32, i32) {
    %c0_i32 = arith.constant 0 : i32
    %c0_i32_0 = arith.constant 0 : i32
    %c0_i32_1 = arith.constant 0 : i32
    return %c0_i32, %c0_i32_0, %arg0 : i32, i32, i32
  }
  func.func @transform_3(%arg0: i32, %arg1: i32, %arg2: i32) -> (i32, i32) {
    %c0_i32 = arith.constant 0 : i32
    %c0_i32_0 = arith.constant 0 : i32
    return %c0_i32, %arg0 : i32, i32
  }
  func.func @transform_4(%arg0: i32, %arg1: i32, %arg2: i32) -> (i32, i32, i32) {
    %c0_i32 = arith.constant 0 : i32
    return %arg1, %arg2, %arg0 : i32, i32, i32
  }
}

</mosaic_0001>

<bundles_post_ra>
// kernel: tpu_custom_call.1
= control target key start
LH: loop header
LB: loop body
LE: loop exit
PB: predicated region body
PF: predicated region fallthrough
CT: control target
= control target key end

     0   :  { %s5379_s0 = inlined_call_operand.vmem [shape: bf16[2,1120,56], index: 0, kind: input, shape index: {}]   ;;  %s5380_s1 = inlined_call_operand.vmem [shape: bf16[2,1120,56], index: 1, kind: input, shape index: {}]   ;;  %s5381_s2 = inlined_call_operand.vmem [shape: bf16[7,56,128], index: 2, kind: input, shape index: {}]   ;;  %s5382_s3 = inlined_call_operand.vmem [shape: f32[1,128], index: 3, kind: input, shape index: {}]   ;;  %s5383_s4 = inlined_call_operand.hbm [shape: bf16[2,1024,128], index: 4, kind: output, shape index: {}]  }
   0x1   :  { %5388 = sst [smem:[#allocation7_spill]] %s5380_s1 }
   0x2   :  { %9 = vsyncpa [#allocation3], 0 }
   0x3   :  { %11 = vsyncpa [#allocation3 + $0x1], 0  ;;  %s4758_s15 = smov 0   ;;  %s4760_s16 = smov 0  }
   0x4   :  { %s4762_s17 = smov 0   ;;  %s4764_s18 = smov 0  }
   0x5   :  { %s4766_s19 = smov 0   ;;  %s4768_s20 = smov 0  }
   0x6   :  { %s4770_s21 = smov 0   ;;  %s4772_s22 = smov 0  }
   0x7 LB: > { %s3311_s23 = sadd.s32 4294967295, %s4728_s22   ;;  %s3312_s24 = sadd.s32 4294967294, %s4728_s22   ;;  %s4728_s22 = sphi %s4772_s22, %s17_s22   ;;  %s4724_s21 = sphi %s4770_s21, %s5404_s21   ;;  %s4720_s20 = sphi %s4768_s20, %s5403_s20   ;;  %s4716_s19 = sphi %s4766_s19, %s5402_s19   ;;  %s4712_s18 = sphi %s4764_s18, %s5401_s18   ;;  %s4708_s17 = sphi %s4762_s17, %s5400_s17   ;;  %s4704_s16 = sphi %s4760_s16, %s5399_s16   ;;  %s4700_s15 = sphi %s4758_s15, %s5398_s15  }
   0x8   : > { %s29_s25 = sadd.s32 1, %s4720_s20  ;;  %s32_s26 = sadd.s32 1, %s4724_s21 }
   0x9   : > { %p30_p0 = scmp.ge.s32.totalorder %s29_s25, 4  ;;  %p161_p1 = scmp.ne.s32.totalorder %s4708_s17, %s4704_s16 }
   0xa   : > { %p162_p2 = scmp.eq.s32.totalorder %s3311_s23, 7  ;;  %p167_p5 = scmp.ne.s32.totalorder %s4704_s16, %s4700_s15 }
   0xb   : > { %s5406_s25 = smov (%p30_p0, %s29_s25), 0  ;;  %s5408_s26 = smov (!%p30_p0, %s32_s26), %s4724_s21 }
   0xc   : > { %5389 = sst [smem:[#allocation5_spill]] %s5406_s25  ;;  %s145_s27 = ssub.s32 %s4720_s20, %s5406_s25 }
   0xd   : > { %p4809_p3 = por %p162_p2, %p161_p1  ;;  %p34_p4 = scmp.ge.s32.totalorder %s5408_s26, 2 }
   0xe   : > { %p168_p6 = scmp.eq.s32.totalorder %s3312_s24, 7  ;;  %p3317_p7 = scmp.ge.s32.totalorder %s4728_s22, 1 }
   0xf   : > { %s5410_s26 = smov (%p34_p4, %s5408_s26), 0  ;;  %p215_p9 = scmp.lt.s32.totalorder %s4728_s22, 9 }
  0x10   : > { %5391 = sst [smem:[#allocation6_spill]] %s5410_s26  ;;  %p4818_p8 = por %p168_p6, %p167_p5 }
  0x11   : > { %s144_s30 = ssub.s32 %s4724_s21, %s5410_s26  ;;  %s151_s5 = sadd.s32 1, %s4708_s17 }
  0x12   : > { %s146_s6 = sor.u32 %s145_s27, %s144_s30  ;;  %p216_p10 = pnand %p3317_p7, %p215_p9 }
  0x13   : > { %p149_p11 = scmp.eq.s32.totalorder %s146_s6, 0  ;;  %v4491_v0 = vld [vmem:[%s5381_s2 + $0x1c] sm:$0xff] (!%p216_p10)   ;;  %v4835_v1 = vld [vmem:[%s5381_s2 + $0x54] sm:$0xff] (!%p216_p10)   ;;  %p253_p12 = scmp.lt.s32.totalorder (!%p216_p10), %s4716_s19, 1  ;;  %v4493_v2 = vld [vmem:[%s5381_s2 + $0x24] sm:$0xff] (!%p216_p10)   ;;  %vm508_vm0 = vcmask (!%p216_p10), 1043456  }
  0x14   : > { %219 = sbr.rel (%p216_p10) target bundleno = 492 (0x1ec), region = 36  ;;  %3929 = vmatprep.subr.bf16.mxu1 (!%p216_p10), %v4491_v0  ;;  %s4842_s14 = sshll.u32 (!%p216_p10), %s4712_s18, 8  ;;  %4049 = vmatprep.subr.bf16.mxu0 (!%p216_p10), %v4835_v1  ;;  %v4494_v3 = vld [vmem:[%s5381_s2 + $0x5c] sm:$0xff] (!%p216_p10)   ;;  %v4495_v4 = vld [vmem:[%s5381_s2 + $0x2c] sm:$0xff] (!%p216_p10)   ;;  %v4859_v5 = vld [vmem:[%s5381_s2 + $0x64] sm:$0xff] (!%p216_p10)   ;;  %vm459_vm1 = vcmask (!%p216_p10), 457728  }
  0x15   : > { %s4827_s7 = scalar_select %p149_p11, %s4708_s17, %s151_s5  }
  0x16   : > { %3930 = vmatpush3.bf16.msra.mxu1 (!%p216_p10), %v4491_v0  ;;  %4050 = vmatpush3.bf16.msra.mxu0 (!%p216_p10), %v4835_v1  ;;  %s273_s6 = sshra.s32 (!%p216_p10), %s4842_s14, 3  ;;  %v4497_v6 = vld [vmem:[%s5381_s2 + $0x34] ss:$0 sps:$4 sm:$0xff] (!%p216_p10)   ;;  %s5393_s1 = sld [smem:[#allocation7_spill]] (!%p216_p10)  ;;  %v4875_v7 = vld [vmem:[%s5381_s2 + $0x6c] ss:$0 sps:$4 sm:$0xff] (!%p216_p10)  }
  0x17   : > { %3931 = vmatprep.subr.bf16.mxu1 (!%p216_p10), %v4493_v2  ;;  %4051 = vmatprep.subr.bf16.mxu0 (!%p216_p10), %v4494_v3  ;;  %s4877_s8 = sshll.u32 (!%p216_p10), %s273_s6, 2  ;;  %v510_v8 = vsel (!%p216_p10), %vm508_vm0, %v4497_v6, 0  ;;  %v4502_v10 = vld [vmem:[%s5381_s2] sm:$0xff] (!%p216_p10)   ;;  %s986_s6 = sadd.s32 (!%p216_p10), 32, %s4842_s14  ;;  %v4504_v11 = vld [vmem:[%s5381_s2 + $0x70] sm:$0xff] (!%p216_p10)   ;;  %v4897_v12 = vsel (!%p216_p10), %vm508_vm0, %v4875_v7, 0 }
  0x18   : > { %s4899_s30 = sshra.s32 (!%p216_p10), %s986_s6, 3  ;;  %v4509_v16 = vld [vmem:[%s5381_s2 + $0x78] sm:$0xff] (!%p216_p10)   ;;  %s1763_s13 = sadd.s32 (!%p216_p10), 64, %s4842_s14  ;;  %v4513_v22 = vld [vmem:[%s5381_s2 + $0x8] sm:$0xff] (!%p216_p10)   ;;  %v4515_v24 = vld [vmem:[%s5381_s2 + $0x80] sm:$0xff] (!%p216_p10)  }
  0x19   : > { %s5384_s5 = sshll.u32 (!%p216_p10), %s4899_s30, 2  ;;  %s4931_s6 = sshra.s32 (!%p216_p10), %s1763_s13, 3  ;;  %v4520_v26 = vld [vmem:[%s5381_s2 + $0x88] ss:$0 sps:$4 sm:$0xff] (!%p216_p10)   ;;  %v4524_v31 = vld [vmem:[%s5381_s2 + $0x10] sm:$0xff] (!%p216_p10)   ;;  %v4544_v46 = vld [vmem:[%s5381_s2 + $0x38] sm:$0xff] (!%p216_p10)  }
  0x1a   : > { %3932 = vmatpush3.bf16.msra.mxu1 (!%p216_p10), %v4493_v2  ;;  %4052 = vmatpush3.bf16.msra.mxu0 (!%p216_p10), %v4494_v3  ;;  %s3491_s13 = sshll.u32 (!%p216_p10), %s4931_s6, 2  ;;  %v1958_v29 = vsel (!%p216_p10), %vm508_vm0, %v4520_v26, 0  ;;  %v4526_v32 = vld [vmem:[%s5381_s2 + $0x8c] sm:$0xff] (!%p216_p10)   ;;  %v4534_v37 = vld [vmem:[%s5381_s2 + $0x18] ss:$0 sps:$4 sm:$0xff] (!%p216_p10)   ;;  %s2540_s25 = sadd.s32 (!%p216_p10), 96, %s4842_s14 }
  0x1b   : > { %s4849_s27 = scalar_select %p253_p12, %s4716_s19, 1  ;;  %3933 = vmatprep.subr.bf16.mxu1 %v4495_v4  ;;  %4053 = vmatprep.subr.bf16.mxu0 %v4859_v5  ;;  %v823_v39 = vsel %vm508_vm0, %v4534_v37, 0  ;;  %v4536_v43 = vld [vmem:[%s5381_s2 + $0x94] sm:$0xff]   ;;  %v4546_v48 = vld [vmem:[%s5381_s2 + $0x9c] sm:$0xff]   ;;  %v4556_v54 = vld [vmem:[%s5381_s2 + $0xa4] ss:$0 sps:$4 sm:$0xff]  }
  0x1c   : > { %s2541_s26 = sshra.s32 %s2540_s25, 3  ;;  %v2345_v55 = vsel %vm508_vm0, %v4556_v54, 0  ;;  %v4566_v60 = vld [vmem:[%s5381_s2 + $0xa8] sm:$0xff]   ;;  %v4554_v2 = vld [vmem:[%s5381_s2 + $0x40] sm:$0xff]  }
  0x1d   : > { %s5385_s10 = smul.u32 560, %s4849_s27  ;;  %v4564_v3 = vld [vmem:[%s5381_s2 + $0x48] sm:$0xff]  }
  0x1e   : > { %3934 = vmatpush3.bf16.msra.mxu1 %v4495_v4  ;;  %4054 = vmatpush3.bf16.msra.mxu0 %v4859_v5 }
  0x1f   : > { %s4870_s24 = scalar_lea.vmem %s5393_s1, %s5385_s10  ;;  %4409 = vmatprep.subr.msk.bf16.mxu1 %vm508_vm0, %v4497_v6  ;;  %4412 = vmatprep.subr.msk.bf16.mxu0 %vm508_vm0, %v4875_v7  ;;  %s5394_s1 = smul.u32 560, %s4849_s27 }
  0x20   : > { %s4882_s9 = scalar_lea.vmem %s4870_s24, %s4877_s8  ;;  %s4909_s11 = scalar_lea.vmem %s4870_s24, %s5384_s5 }
  0x21   : > { %v4499_v9 = vld [vmem:[%s4882_s9] sm:$0xff]   ;;  %v4501_v13 = vld [vmem:[%s4882_s9 + $0x8] sm:$0xff]   ;;  %v4505_v14 = vld [vmem:[%s4882_s9 + $0x10] sm:$0xff]   ;;  %s4942_s23 = scalar_lea.vmem %s5379_s0, %s5394_s1  ;;  %s3579_s5 = sshll.u32 %s2541_s26, 2 }
  0x22   : > { %3937 = vmatprep.mubr.msk.bf16.mxu1 %vm459_vm1, %v4499_v9  ;;  %3936 = vmatpush3.bf16.msra.mxu1 %v510_v8  ;;  %v4500_v15 = vld [vmem:[%s4909_s11] sm:$0xff]   ;;  %v4503_v17 = vld [vmem:[%s4909_s11 + $0x8] sm:$0xff]   ;;  %v4506_v18 = vld [vmem:[%s4909_s11 + $0x10] sm:$0xff]   ;;  %s4956_s1 = scalar_lea.vmem %s4942_s23, %s3491_s13  ;;  %s4992_s12 = scalar_lea.vmem %s4942_s23, %s4877_s8 }
  0x23   : > { %4056 = vmatpush3.bf16.msra.mxu0 %v4897_v12  ;;  %3969 = vmatprep.subr.bf16.mxu1 %v4502_v10  ;;  %v4507_v19 = vld [vmem:[%s4882_s9 + $0x18] sm:$0xff]   ;;  %v4510_v21 = vld [vmem:[%s4882_s9 + $0x20] sm:$0xff]   ;;  %v4512_v25 = vld [vmem:[%s4882_s9 + $0x28] sm:$0xff]   ;;  %s4996_s27 = scalar_lea.vmem %s4942_s23, %s3579_s5  ;;  %s5035_s8 = scalar_lea.vmem %s4870_s24, %s3491_s13 }
  0x24   : > { %4057 = vmatprep.mubr.msk.bf16.mxu0 %vm459_vm1, %v4500_v15  ;;  %4089 = vmatprep.subr.bf16.mxu0 %v4504_v11  ;;  %v4508_v20 = vld [vmem:[%s4909_s11 + $0x18] sm:$0xff]   ;;  %v4511_v23 = vld [vmem:[%s4909_s11 + $0x20] sm:$0xff]   ;;  %v4514_v27 = vld [vmem:[%s4909_s11 + $0x28] sm:$0xff]   ;;  %s5395_s5 = sshll.u32 %s4899_s30, 2 }
  0x25   : > { %3938 = vmatmul.mubr.msk.bf16.vlgmr.msra.gmra.mrb[0].mxu1 %vm459_vm1, %v4501_v13  ;;  %v4516_v28 = vld [vmem:[%s4882_s9 + $0x30] sm:$0xff]   ;;  %v4518_v33 = vld [vmem:[%s4882_s9 + $0x38] sm:$0xff]   ;;  %v4521_v35 = vld [vmem:[%s4882_s9 + $0x40] sm:$0xff]   ;;  %s5067_s14 = scalar_lea.vmem %s4942_s23, %s5395_s5  ;;  %s3657_s23 = sshll.u32 %s4712_s18, 5 }
  0x26   : > { %4058 = vmatmul.mubr.msk.bf16.vlgmr.msra.gmra.mrb[0].mxu0 %vm459_vm1, %v4503_v17  ;;  %3970 = vmatpush3.bf16.msra.mxu1 %v4502_v10  ;;  %v4517_v30 = vld [vmem:[%s4909_s11 + $0x30] sm:$0xff]   ;;  %v4519_v34 = vld [vmem:[%s4909_s11 + $0x38] sm:$0xff]   ;;  %v4522_v36 = vld [vmem:[%s4956_s1] sm:$0xff]   ;;  %s4730_s5 = smov [#allocation2]  }
  0x27   : > { %4090 = vmatpush3.bf16.msra.mxu0 %v4504_v11  ;;  %3941 = vmatprep.mubr.msk.bf16.mxu1 %vm459_vm1, %v4505_v14  ;;  %v4523_v38 = vld [vmem:[%s4882_s9 + $0x48] sm:$0xff]   ;;  %v4527_v41 = vld [vmem:[%s4882_s9 + $0x50] sm:$0xff]   ;;  %v4529_v44 = vld [vmem:[%s4882_s9 + $0x58] sm:$0xff]   ;;  %s4638_s10 = sshll.u32 %s4730_s5, 4  ;;  %s4639_s10 = int_to_ptr.vmem [resolvable:$false] %s4638_s10 }
  0x28   : > { %4061 = vmatprep.mubr.msk.bf16.mxu0 %vm459_vm1, %v4506_v18  ;;  %4091 = vmatprep.subr.bf16.mxu0 %v4509_v16  ;;  %v4525_v40 = vld [vmem:[%s4956_s1 + $0x8] sm:$0xff]   ;;  %v4528_v42 = vld [vmem:[%s4956_s1 + $0x10] sm:$0xff]   ;;  %v4530_v45 = vld [vmem:[%s4956_s1 + $0x18] sm:$0xff]   ;;  %s4640_s25 = scalar_lea.vmem %s4639_s10, 4096 }
  0x29   : > { %3971 = vmatprep.subr.bf16.mxu1 %v4513_v22  ;;  %v4531_v47 = vld [vmem:[%s4882_s9 + $0x60] sm:$0xff]   ;;  %v4533_v50 = vld [vmem:[%s4882_s9 + $0x68] sm:$0xff]   ;;  %v4537_v52 = vld [vmem:[%s4882_s9 + $0x70] sm:$0xff]  }
  0x2a   : > { %3972 = vmatpush3.bf16.msra.mxu1 %v4513_v22  ;;  %v4532_v49 = vld [vmem:[%s4956_s1 + $0x20] sm:$0xff]   ;;  %v4535_v51 = vld [vmem:[%s4956_s1 + $0x28] sm:$0xff]   ;;  %v4538_v53 = vld [vmem:[%s4956_s1 + $0x30] sm:$0xff]  }
  0x2b   : > { %4092 = vmatpush3.bf16.msra.mxu0 %v4509_v16  ;;  %3973 = vmatprep.subr.bf16.mxu1 %v4524_v31  ;;  %v4539_v56 = vld [vmem:[%s4882_s9 + $0x78] sm:$0xff]   ;;  %v4541_v58 = vld [vmem:[%s4992_s12] sm:$0xff]   ;;  %v4543_v61 = vld [vmem:[%s4992_s12 + $0x8] sm:$0xff]  }
  0x2c   : > { %4093 = vmatprep.subr.bf16.mxu0 %v4515_v24  ;;  %v4540_v57 = vld [vmem:[%s4956_s1 + $0x38] sm:$0xff]   ;;  %v4542_v59 = vld [vmem:[%s4956_s1 + $0x40] sm:$0xff]   ;;  %v4545_v62 = vld [vmem:[%s4956_s1 + $0x48] sm:$0xff]  }
  0x2d   : > { %3942 = vmatmul.mubr.msk.bf16.gmra.mrb[4].mxu1 %vm459_vm1, %v4507_v19  ;;  %v4547_v63 = vld [vmem:[%s4992_s12 + $0x10] sm:$0xff]   ;;  %v4549_v4 = vld [vmem:[%s4992_s12 + $0x18] sm:$0xff]   ;;  %v4551_v8 = vld [vmem:[%s4992_s12 + $0x20] sm:$0xff]  }
  0x2e   : > { %4062 = vmatmul.mubr.msk.bf16.gmra.mrb[4].mxu0 %vm459_vm1, %v4508_v20  ;;  %3945 = vmatprep.mubr.msk.bf16.mxu1 %vm459_vm1, %v4510_v21  ;;  %v4548_v0 = vld [vmem:[%s4956_s1 + $0x50] sm:$0xff]   ;;  %v4550_v6 = vld [vmem:[%s4956_s1 + $0x58] sm:$0xff]   ;;  %v4552_v9 = vld [vmem:[%s4956_s1 + $0x60] sm:$0xff]  }
  0x2f   : > { %4065 = vmatprep.mubr.msk.bf16.mxu0 %vm459_vm1, %v4511_v23  ;;  %4094 = vmatpush3.bf16.msra.mxu0 %v4515_v24  ;;  %v4574_v10 = vld [vmem:[%s5381_s2 + $0x50] ss:$0 sps:$4 sm:$0xff]   ;;  %v4553_v11 = vld [vmem:[%s4992_s12 + $0x28] sm:$0xff]   ;;  %v4559_v17 = vld [vmem:[%s4992_s12 + $0x38] sm:$0xff]  }
  0x30   : > { %4414 = vmatprep.subr.msk.bf16.mxu0 %vm508_vm0, %v4520_v26  ;;  %3974 = vmatpush3.bf16.msra.mxu1 %v4524_v31  ;;  %v1181_v13 = vsel %vm508_vm0, %v4574_v10, 0  ;;  %v4555_v14 = vld [vmem:[%s4956_s1 + $0x68] sm:$0xff]   ;;  %v4557_v15 = vld [vmem:[%s4992_s12 + $0x30] sm:$0xff]   ;;  %v4560_v18 = vld [vmem:[%s4956_s1 + $0x78] sm:$0xff]  }
  0x31   : > { %4410 = vmatprep.subr.msk.bf16.mxu1 %vm508_vm0, %v4534_v37  ;;  %v4558_v16 = vld [vmem:[%s4956_s1 + $0x70] sm:$0xff]   ;;  %v4561_v19 = vld [vmem:[%s4992_s12 + $0x40] sm:$0xff]   ;;  %v4565_v21 = vld [vmem:[%s5035_s8 + $0x8] sm:$0xff]   ;;  %s3658_s1 = sshll.u32 %s4716_s19, 7 }
  0x32   : > { %v4562_v20 = vld [vmem:[%s5035_s8] sm:$0xff]   ;;  %v4567_v22 = vld [vmem:[%s4992_s12 + $0x50] sm:$0xff]   ;;  %v4585_v26 = vld [vmem:[%s5381_s2 + $0xb8] sm:$0xff]   ;;  %s3175_s26 = sadd.s32 %s3658_s1, %s3657_s23 }
  0x33   : > { %4096 = vmatpush3.bf16.msra.mxu0 %v1958_v29  ;;  %v4568_v23 = vld [vmem:[%s5035_s8 + $0x10] sm:$0xff]   ;;  %v4572_v29 = vld [vmem:[%s5035_s8 + $0x20] sm:$0xff]   ;;  %v4573_v31 = vld [vmem:[%s4992_s12 + $0x68] sm:$0xff]   ;;  %s3659_s18 = sshll.u32 %s3175_s26, 6 }
  0x34   : > { %4129 = vmatprep.subr.bf16.mxu0 %v4526_v32  ;;  %3976 = vmatpush3.bf16.msra.mxu1 %v823_v39  ;;  %v4576_v24 = vld [vmem:[%s5381_s2 + $0xb0] sm:$0xff]   ;;  %v4580_v37 = vld [vmem:[%s5035_s8 + $0x38] sm:$0xff]   ;;  %v4582_v39 = vld [vmem:[%s5035_s8 + $0x40] sm:$0xff]  }
  0x35   : > { %3946 = vmatmul.mubr.msk.bf16.gmra.mrb[8].mxu1 %vm459_vm1, %v4512_v25  ;;  %4009 = vmatprep.subr.bf16.mxu1 %v4544_v46  ;;  %v4569_v25 = vld [vmem:[%s4992_s12 + $0x58] sm:$0xff]  }
  0x36   : > { %4066 = vmatmul.mubr.msk.bf16.gmra.mrb[8].mxu0 %vm459_vm1, %v4514_v27  ;;  %3949 = vmatprep.mubr.msk.bf16.mxu1 %vm459_vm1, %v4516_v28  ;;  %v4570_v27 = vld [vmem:[%s5035_s8 + $0x18] sm:$0xff]   ;;  %v4571_v28 = vld [vmem:[%s4992_s12 + $0x60] sm:$0xff]  }
  0x37   : > { %4069 = vmatprep.mubr.msk.bf16.mxu0 %vm459_vm1, %v4517_v30  ;;  %v4594_v30 = vld [vmem:[%s5381_s2 + $0xc0] ss:$0 sps:$4 sm:$0xff]  }
  0x3d   : > { %3950 = vmatmul.mubr.msk.bf16.gmra.mrb[12].mxu1 %vm459_vm1, %v4518_v33  ;;  %v4575_v33 = vld [vmem:[%s5035_s8 + $0x28] sm:$0xff]  }
  0x3e   : > { %4070 = vmatmul.mubr.msk.bf16.gmra.mrb[12].mxu0 %vm459_vm1, %v4519_v34  ;;  %3953 = vmatprep.mubr.msk.bf16.mxu1 %vm459_vm1, %v4521_v35  ;;  %v4577_v34 = vld [vmem:[%s4992_s12 + $0x70] sm:$0xff]  }
  0x3f   : > { %4097 = vmatprep.mubr.msk.bf16.mxu0 %vm459_vm1, %v4522_v36  ;;  %v4578_v35 = vld [vmem:[%s5035_s8 + $0x30] sm:$0xff]   ;;  %v4579_v36 = vld [vmem:[%s4992_s12 + $0x78] sm:$0xff]  }
  0x45   : > { %3954 = vmatmul.mubr.msk.bf16.gmra.mrb[16].mxu1 %vm459_vm1, %v4523_v38  ;;  %v4581_v38 = vld [vmem:[%s5067_s14] sm:$0xff]  }
  0x46   : > { %4098 = vmatmul.mubr.msk.bf16.vlgmr.msra.gmra.mrb[0].mxu0 %vm459_vm1, %v4525_v40  ;;  %3957 = vmatprep.mubr.msk.bf16.mxu1 %vm459_vm1, %v4527_v41  ;;  %v4583_v40 = vld [vmem:[%s5067_s14 + $0x8] sm:$0xff]  }
  0x47   : > { %4130 = vmatpush3.bf16.msra.mxu0 %v4526_v32  ;;  %4101 = vmatprep.mubr.msk.bf16.mxu0 %vm459_vm1, %v4528_v42  ;;  %v2735_v32 = vsel %vm508_vm0, %v4594_v30, 0  ;;  %v4584_v41 = vld [vmem:[%s5035_s8 + $0x48] sm:$0xff]   ;;  %v4586_v42 = vld [vmem:[%s5067_s14 + $0x10] sm:$0xff]  }
  0x48   : > { %4131 = vmatprep.subr.bf16.mxu0 %v4536_v43 }
  0x4b   : > { %4132 = vmatpush3.bf16.msra.mxu0 %v4536_v43  ;;  %v4587_v43 = vld [vmem:[%s5035_s8 + $0x50] sm:$0xff]  }
  0x4c   : > { %4133 = vmatprep.subr.bf16.mxu0 %v4546_v48 }
  0x4d   : > { %3958 = vmatmul.mubr.msk.bf16.gmra.mrb[20].mxu1 %vm459_vm1, %v4529_v44  ;;  %v4631_v44 = vld [vmem:[%s5381_s2 + $0x54] sm:$0xff]  }
  0x4e   : > { %4102 = vmatmul.mubr.msk.bf16.gmra.mrb[4].mxu0 %vm459_vm1, %v4530_v45  ;;  %3961 = vmatprep.mubr.msk.bf16.mxu1 %vm459_vm1, %v4531_v47  ;;  %v4632_v45 = vld [vmem:[%s5381_s2 + $0x5c] sm:$0xff]  }
  0x4f   : > { %4105 = vmatprep.mubr.msk.bf16.mxu0 %vm459_vm1, %v4532_v49  ;;  %4134 = vmatpush3.bf16.msra.mxu0 %v4546_v48  ;;  %v4589_v47 = vld [vmem:[%s5035_s8 + $0x58] sm:$0xff]   ;;  %v4590_v48 = vld [vmem:[%s5067_s14 + $0x20] sm:$0xff]  }
  0x50   : > { %4415 = vmatprep.subr.msk.bf16.mxu0 %vm508_vm0, %v4556_v54  ;;  %v4591_v49 = vld [vmem:[%s5035_s8 + $0x60] sm:$0xff]   ;;  %v4597_v54 = vld [vmem:[%s5067_s14 + $0x38] sm:$0xff]  }
  0x53   : > { %4136 = vmatpush3.bf16.msra.mxu0 %v2345_v55  ;;  %v4599_v55 = vld [vmem:[%s5067_s14 + $0x40] sm:$0xff]  }
  0x54   : > { %4169 = vmatprep.subr.bf16.mxu0 %v4566_v60 }
  0x55   : > { %3962 = vmatmul.mubr.msk.bf16.gmra.mrb[24].mxu1 %vm459_vm1, %v4533_v50  ;;  %v4633_v50 = vld [vmem:[%s5381_s2 + $0x64] sm:$0xff]  }
  0x56   : > { %4106 = vmatmul.mubr.msk.bf16.gmra.mrb[8].mxu0 %vm459_vm1, %v4535_v51  ;;  %3965 = vmatprep.mubr.msk.bf16.mxu1 %vm459_vm1, %v4537_v52  ;;  %v4593_v51 = vld [vmem:[%s5035_s8 + $0x68] sm:$0xff]   ;;  %v4595_v52 = vld [vmem:[%s5067_s14 + $0x30] sm:$0xff]  }
  0x57   : > { %4109 = vmatprep.mubr.msk.bf16.mxu0 %vm459_vm1, %v4538_v53  ;;  %v4596_v53 = vld [vmem:[%s5035_s8 + $0x70] sm:$0xff]  }
  0x5d   : > { %3966 = vmatmul.mubr.msk.bf16.gmra.mrb[28].mxu1 %vm459_vm1, %v4539_v56  ;;  %v4600_v56 = vld [vmem:[%s4996_s27] sm:$0xff]  }
  0x5e   : > { %4110 = vmatmul.mubr.msk.bf16.gmra.mrb[12].mxu0 %vm459_vm1, %v4540_v57  ;;  %3977 = vmatprep.mubr.msk.bf16.mxu1 %vm459_vm1, %v4541_v58  ;;  %v4602_v57 = vld [vmem:[%s4996_s27 + $0x8] sm:$0xff]   ;;  %v4603_v58 = vld [vmem:[%s5067_s14 + $0x50] sm:$0xff]  }
  0x5f   : > { %4113 = vmatprep.mubr.msk.bf16.mxu0 %vm459_vm1, %v4542_v59  ;;  %v4604_v59 = vld [vmem:[%s4996_s27 + $0x10] sm:$0xff]  }
  0x65   : > { %3978 = vmatmul.mubr.msk.bf16.vlgmr.msra.gmra.mrb[0].mxu1 %vm459_vm1, %v4543_v61  ;;  %v4606_v61 = vld [vmem:[%s4996_s27 + $0x18] sm:$0xff]  }
  0x66   : > { %4114 = vmatmul.mubr.msk.bf16.gmra.mrb[16].mxu0 %vm459_vm1, %v4545_v62  ;;  %4010 = vmatpush3.bf16.msra.mxu1 %v4544_v46  ;;  %v4588_v46 = vld [vmem:[%s5067_s14 + $0x18] sm:$0xff]   ;;  %v4607_v62 = vld [vmem:[%s5067_s14 + $0x60] sm:$0xff]  }
  0x67   : > { %3981 = vmatprep.mubr.msk.bf16.mxu1 %vm459_vm1, %v4547_v63  ;;  %4117 = vmatprep.mubr.msk.bf16.mxu0 %vm459_vm1, %v4548_v0  ;;  %v4608_v63 = vld [vmem:[%s4996_s27 + $0x20] sm:$0xff]   ;;  %v4609_v0 = vld [vmem:[%s5067_s14 + $0x68] sm:$0xff]  }
  0x68   : > { %4011 = vmatprep.subr.bf16.mxu1 %v4554_v2 }
  0x6a   : > { %4012 = vmatpush3.bf16.msra.mxu1 %v4554_v2  ;;  %v4610_v2 = vld [vmem:[%s4996_s27 + $0x28] sm:$0xff]  }
  0x6b   : > { %4013 = vmatprep.subr.bf16.mxu1 %v4564_v3 }
  0x6d   : > { %3982 = vmatmul.mubr.msk.bf16.gmra.mrb[4].mxu1 %vm459_vm1, %v4549_v4  ;;  %v4612_v4 = vld [vmem:[%s4996_s27 + $0x30] sm:$0xff]  }
  0x6e   : > { %4118 = vmatmul.mubr.msk.bf16.gmra.mrb[20].mxu0 %vm459_vm1, %v4550_v6  ;;  %3985 = vmatprep.mubr.msk.bf16.mxu1 %vm459_vm1, %v4551_v8  ;;  %v4613_v6 = vld [vmem:[%s5067_s14 + $0x78] sm:$0xff]  }
  0x6f   : > { %4121 = vmatprep.mubr.msk.bf16.mxu0 %vm459_vm1, %v4552_v9  ;;  %4014 = vmatpush3.bf16.msra.mxu1 %v4564_v3  ;;  %v4611_v3 = vld [vmem:[%s5067_s14 + $0x70] sm:$0xff]   ;;  %v4614_v8 = vld [vmem:[%s4996_s27 + $0x38] sm:$0xff]   ;;  %v4615_v9 = vld [vmem:[%s4909_s11 + $0x40] sm:$0xff]  }
  0x70   : > { %4411 = vmatprep.subr.msk.bf16.mxu1 %vm508_vm0, %v4574_v10  ;;  %v4616_v10 = vld [vmem:[%s4996_s27 + $0x40] sm:$0xff]  }
  0x73   : > { %4016 = vmatpush3.bf16.msra.mxu1 %v1181_v13  ;;  %v4618_v13 = vld [vmem:[%s4996_s27 + $0x48] sm:$0xff]  }
  0x74   : > { %4209 = vmatprep.subr.bf16.mxu1 %v4835_v1  ;;  %v4563_v1 = vld [vmem:[%s4992_s12 + $0x48] sm:$0xff]   ;;  %s5319_s12 = scalar_lea.hbm %s5383_s4, %s3659_s18 }
  0x75   : > { %3986 = vmatmul.mubr.msk.bf16.gmra.mrb[8].mxu1 %vm459_vm1, %v4553_v11  ;;  %v4617_v11 = vld [vmem:[%s4909_s11 + $0x48] sm:$0xff]  }
  0x76   : > { %4122 = vmatmul.mubr.msk.bf16.gmra.mrb[24].mxu0 %vm459_vm1, %v4555_v14  ;;  %3989 = vmatprep.mubr.msk.bf16.mxu1 %vm459_vm1, %v4557_v15  ;;  %v4619_v14 = vld [vmem:[%s4909_s11 + $0x50] sm:$0xff]  }
  0x77   : > { %4125 = vmatprep.mubr.msk.bf16.mxu0 %vm459_vm1, %v4558_v16  ;;  %v4620_v15 = vld [vmem:[%s4996_s27 + $0x50] sm:$0xff]   ;;  %v4621_v16 = vld [vmem:[%s4909_s11 + $0x58] sm:$0xff]  }
  0x7d   : > { %3990 = vmatmul.mubr.msk.bf16.gmra.mrb[12].mxu1 %vm459_vm1, %v4559_v17  ;;  %v4622_v17 = vld [vmem:[%s4996_s27 + $0x58] sm:$0xff]  }
  0x7e   : > { %4126 = vmatmul.mubr.msk.bf16.gmra.mrb[28].mxu0 %vm459_vm1, %v4560_v18  ;;  %3993 = vmatprep.mubr.msk.bf16.mxu1 %vm459_vm1, %v4561_v19  ;;  %v4623_v18 = vld [vmem:[%s4909_s11 + $0x60] sm:$0xff]  }
  0x7f   : > { %4137 = vmatprep.mubr.msk.bf16.mxu0 %vm459_vm1, %v4562_v20  ;;  %v4624_v19 = vld [vmem:[%s4996_s27 + $0x60] sm:$0xff]   ;;  %v4625_v20 = vld [vmem:[%s4909_s11 + $0x68] sm:$0xff]  }
  0x85   : > { %3994 = vmatmul.mubr.msk.bf16.gmra.mrb[16].mxu1 %vm459_vm1, %v4563_v1  ;;  %v4626_v1 = vld [vmem:[%s4996_s27 + $0x68] sm:$0xff]  }
  0x86   : > { %4138 = vmatmul.mubr.msk.bf16.vlgmr.msra.gmra.mrb[0].mxu0 %vm459_vm1, %v4565_v21  ;;  %3997 = vmatprep.mubr.msk.bf16.mxu1 %vm459_vm1, %v4567_v22  ;;  %v4627_v21 = vld [vmem:[%s4909_s11 + $0x70] sm:$0xff]  }
  0x87   : > { %4170 = vmatpush3.bf16.msra.mxu0 %v4566_v60  ;;  %4141 = vmatprep.mubr.msk.bf16.mxu0 %vm459_vm1, %v4568_v23  ;;  %v4605_v60 = vld [vmem:[%s5067_s14 + $0x58] sm:$0xff]   ;;  %v4628_v22 = vld [vmem:[%s4996_s27 + $0x70] sm:$0xff]  }
  0x88   : > { %4171 = vmatprep.subr.bf16.mxu0 %v4576_v24  ;;  %v4629_v23 = vld [vmem:[%s4909_s11 + $0x78] sm:$0xff]  }
  0x8b   : > { %4172 = vmatpush3.bf16.msra.mxu0 %v4576_v24  ;;  %v4630_v24 = vld [vmem:[%s4996_s27 + $0x78] sm:$0xff]  }
  0x8c   : > { %4173 = vmatprep.subr.bf16.mxu0 %v4585_v26 }
  0x8d   : > { %3998 = vmatmul.mubr.msk.bf16.gmra.mrb[20].mxu1 %vm459_vm1, %v4569_v25 }
  0x8e   : > { %4142 = vmatmul.mubr.msk.bf16.gmra.mrb[4].mxu0 %vm459_vm1, %v4570_v27  ;;  %4001 = vmatprep.mubr.msk.bf16.mxu1 %vm459_vm1, %v4571_v28 }
  0x8f   : > { %4145 = vmatprep.mubr.msk.bf16.mxu0 %vm459_vm1, %v4572_v29  ;;  %4174 = vmatpush3.bf16.msra.mxu0 %v4585_v26 }
  0x90   : > { %4416 = vmatprep.subr.msk.bf16.mxu0 %vm508_vm0, %v4594_v30 }
  0x93   : > { %4176 = vmatpush3.bf16.msra.mxu0 %v2735_v32 }
  0x95   : > { %4002 = vmatmul.mubr.msk.bf16.gmra.mrb[24].mxu1 %vm459_vm1, %v4573_v31 }
  0x96   : > { %4146 = vmatmul.mubr.msk.bf16.gmra.mrb[8].mxu0 %vm459_vm1, %v4575_v33  ;;  %4005 = vmatprep.mubr.msk.bf16.mxu1 %vm459_vm1, %v4577_v34 }
  0x97   : > { %4149 = vmatprep.mubr.msk.bf16.mxu0 %vm459_vm1, %v4578_v35 }
  0x9d   : > { %4006 = vmatmul.mubr.msk.bf16.gmra.mrb[28].mxu1 %vm459_vm1, %v4579_v36 }
  0x9e   : > { %4150 = vmatmul.mubr.msk.bf16.gmra.mrb[12].mxu0 %vm459_vm1, %v4580_v37  ;;  %4017 = vmatprep.mubr.msk.bf16.mxu1 %vm459_vm1, %v4581_v38 }
  0x9f   : > { %4153 = vmatprep.mubr.msk.bf16.mxu0 %vm459_vm1, %v4582_v39 }
  0xa5   : > { %4018 = vmatmul.mubr.msk.bf16.vlgmr.msra.gmra.mrb[0].mxu1 %vm459_vm1, %v4583_v40 }
  0xa6   : > { %4154 = vmatmul.mubr.msk.bf16.gmra.mrb[16].mxu0 %vm459_vm1, %v4584_v41  ;;  %4213 = vmatpush3.bf16.msra.mxu1 %v4631_v44 }
  0xa7   : > { %4021 = vmatprep.mubr.msk.bf16.mxu1 %vm459_vm1, %v4586_v42  ;;  %4157 = vmatprep.mubr.msk.bf16.mxu0 %vm459_vm1, %v4587_v43  ;;  %v5256_v42 = vld [vmem:[%s5382_s3] ss:$0 sm:$0xff] }
  0xa8   : > { %4210 = vmatprep.subr.bf16.mxu1 %v4632_v45 }
  0xaa   : > { %4214 = vmatpush3.bf16.msra.mxu1 %v4632_v45 }
  0xab   : > { %4211 = vmatprep.subr.bf16.mxu1 %v4859_v5  ;;  %v4592_v5 = vld [vmem:[%s5067_s14 + $0x28] sm:$0xff]  }
  0xad   : > { %4022 = vmatmul.mubr.msk.bf16.gmra.mrb[4].mxu1 %vm459_vm1, %v4588_v46 }
  0xae   : > { %4158 = vmatmul.mubr.msk.bf16.gmra.mrb[20].mxu0 %vm459_vm1, %v4589_v47  ;;  %4025 = vmatprep.mubr.msk.bf16.mxu1 %vm459_vm1, %v4590_v48 }
  0xaf   : > { %4161 = vmatprep.mubr.msk.bf16.mxu0 %vm459_vm1, %v4591_v49  ;;  %4215 = vmatpush3.bf16.msra.mxu1 %v4633_v50 }
  0xb0   : > { %4413 = vmatprep.subr.msk.bf16.mxu1 %vm508_vm0, %v4875_v7  ;;  %v4598_v7 = vld [vmem:[%s5035_s8 + $0x78] sm:$0xff]   ;;  %s250_s8 = sand.u32 1, %s4704_s16  }
  0xb1   : > { %s5327_s6 = scalar_lea.sflag [#allocation3], %s250_s8 }
  0xb3   : > { %4216 = vmatpush3.bf16.msra.mxu1 %v4897_v12  ;;  %v4601_v12 = vld [vmem:[%s5067_s14 + $0x48] sm:$0xff]   ;;  %s3318_s14 = sshll.u32 %s250_s8, 7 }
  0xb4   : > { %s5265_s30 = scalar_lea.vmem [#allocation2], %s3318_s14 }
  0xb5   : > { %4026 = vmatmul.mubr.msk.bf16.gmra.mrb[8].mxu1 %vm459_vm1, %v4592_v5  ;;  %s3178_s19 = sshll.u32 %s5265_s30, 4  ;;  %s5321_s19 = int_to_ptr.vmem [resolvable:$true] %s3178_s19 }
  0xb6   : > { %4162 = vmatmul.mubr.msk.bf16.gmra.mrb[24].mxu0 %vm459_vm1, %v4593_v51  ;;  %4029 = vmatprep.mubr.msk.bf16.mxu1 %vm459_vm1, %v4595_v52  ;;  %s4634_s13 = scalar_lea.vmem %s5321_s19, 2048  ;;  %p4641_p2 = scmp.lt.s32.totalorder %s5321_s19, %s4639_s10 }
  0xb7   : > { %4165 = vmatprep.mubr.msk.bf16.mxu0 %vm459_vm1, %v4596_v53  ;;  %p4635_p13 = scmp.ne.s32.totalorder %s5321_s19, %s4634_s13  ;;  %p4642_p4 = scmp.lt.s32.totalorder %s4640_s25, %s4634_s13 }
  0xb9   : > { %p4636_p0 = pnand %p4635_p13, %p4809_p3  ;;  %p4643_p5 = por %p4642_p4, %p4641_p2 }
  0xbb   : > { %p4637_p1 = pneg %p4636_p0 }
  0xbd   : > { %4030 = vmatmul.mubr.msk.bf16.gmra.mrb[12].mxu1 %vm459_vm1, %v4597_v54  ;;  %p4644_p6 = pnand %p4643_p5, %p4637_p1 }
  0xbe   : > { %4166 = vmatmul.mubr.msk.bf16.gmra.mrb[28].mxu0 %vm459_vm1, %v4598_v7  ;;  %4033 = vmatprep.mubr.msk.bf16.mxu1 %vm459_vm1, %v4599_v55 }
  0xbf   : > { %4177 = vmatprep.mubr.msk.bf16.mxu0 %vm459_vm1, %v4600_v56 }
  0xc5   : > { %4034 = vmatmul.mubr.msk.bf16.gmra.mrb[16].mxu1 %vm459_vm1, %v4601_v12 }
  0xc6   : > { %4178 = vmatmul.mubr.msk.bf16.vlgmr.msra.gmra.mrb[0].mxu0 %vm459_vm1, %v4602_v57  ;;  %4037 = vmatprep.mubr.msk.bf16.mxu1 %vm459_vm1, %v4603_v58 }
  0xc7   : > { %4181 = vmatprep.mubr.msk.bf16.mxu0 %vm459_vm1, %v4604_v59 }
  0xcd   : > { %4038 = vmatmul.mubr.msk.bf16.gmra.mrb[20].mxu1 %vm459_vm1, %v4605_v60 }
  0xce   : > { %4182 = vmatmul.mubr.msk.bf16.gmra.mrb[4].mxu0 %vm459_vm1, %v4606_v61  ;;  %4041 = vmatprep.mubr.msk.bf16.mxu1 %vm459_vm1, %v4607_v62 }
  0xcf   : > { %4185 = vmatprep.mubr.msk.bf16.mxu0 %vm459_vm1, %v4608_v63 }
  0xd5   : > { %4042 = vmatmul.mubr.msk.bf16.gmra.mrb[24].mxu1 %vm459_vm1, %v4609_v0 }
  0xd6   : > { %4186 = vmatmul.mubr.msk.bf16.gmra.mrb[8].mxu0 %vm459_vm1, %v4610_v2  ;;  %4045 = vmatprep.mubr.msk.bf16.mxu1 %vm459_vm1, %v4611_v3 }
  0xd7   : > { %4189 = vmatprep.mubr.msk.bf16.mxu0 %vm459_vm1, %v4612_v4 }
  0xdd   : > { %4046 = vmatmul.mubr.msk.bf16.gmra.mrb[28].mxu1 %vm459_vm1, %v4613_v6 }
  0xde   : > { %4190 = vmatmul.mubr.msk.bf16.gmra.mrb[12].mxu0 %vm459_vm1, %v4614_v8  ;;  %4073 = vmatprep.mubr.msk.bf16.mxu1 %vm459_vm1, %v4615_v9 }
  0xdf   : > { %4193 = vmatprep.mubr.msk.bf16.mxu0 %vm459_vm1, %v4616_v10 }
  0xe5   : > { %4074 = vmatmul.mubr.msk.bf16.vlgmr.msra.gmra.mrb[16].mxu1 %vm459_vm1, %v4617_v11 }
  0xe6   : > { %4194 = vmatmul.mubr.msk.bf16.gmra.mrb[16].mxu0 %vm459_vm1, %v4618_v13  ;;  %4077 = vmatprep.mubr.msk.bf16.mxu1 %vm459_vm1, %v4619_v14 }
  0xe7   : > { %4197 = vmatprep.mubr.msk.bf16.mxu0 %vm459_vm1, %v4620_v15 }
  0xed   : > { %4078 = vmatmul.mubr.msk.bf16.gmra.mrb[20].mxu1 %vm459_vm1, %v4621_v16 }
  0xee   : > { %4198 = vmatmul.mubr.msk.bf16.gmra.mrb[20].mxu0 %vm459_vm1, %v4622_v17  ;;  %4081 = vmatprep.mubr.msk.bf16.mxu1 %vm459_vm1, %v4623_v18 }
  0xef   : > { %4201 = vmatprep.mubr.msk.bf16.mxu0 %vm459_vm1, %v4624_v19 }
  0xf5   : > { %4082 = vmatmul.mubr.msk.bf16.gmra.mrb[24].mxu1 %vm459_vm1, %v4625_v20 }
  0xf6   : > { %4202 = vmatmul.mubr.msk.bf16.gmra.mrb[24].mxu0 %vm459_vm1, %v4626_v1  ;;  %4085 = vmatprep.mubr.msk.bf16.mxu1 %vm459_vm1, %v4627_v21 }
  0xf7   : > { %4205 = vmatprep.mubr.msk.bf16.mxu0 %vm459_vm1, %v4628_v22 }
  0xfd   : > { %4086 = vmatmul.mubr.msk.bf16.gmra.mrb[28].mxu1 %vm459_vm1, %v4629_v23 }
  0xfe   : > { %4206 = vmatmul.mubr.msk.bf16.gmra.mrb[28].mxu0 %vm459_vm1, %v4630_v24 }
 0x178   : > { %v4019_v25 = vpop.f32.mrb[0].mxu1 }
 0x179   : > { %v1217_v26 = vpop.f32.mrb[1].mxu1 }
 0x17a   : > { %v4020_v27 = vpop.f32.mrb[2].mxu1 }
 0x17b   : > { %v1220_v28 = vpop.f32.mrb[3].mxu1 }
 0x180   : > { %v4023_v29 = vpop.f32.mrb[4].mxu1 }
 0x181   : > { %v1233_v30 = vpop.f32.mrb[5].mxu1 }
 0x182   : > { %v4024_v31 = vpop.f32.mrb[6].mxu1 }
 0x183   : > { %v1236_v32 = vpop.f32.mrb[7].mxu1 }
 0x188   : > { %v4027_v33 = vpop.f32.mrb[8].mxu1 }
 0x189   : > { %v1249_v34 = vpop.f32.mrb[9].mxu1 }
 0x18a   : > { %v4028_v35 = vpop.f32.mrb[10].mxu1 }
 0x18b   : > { %v1252_v36 = vpop.f32.mrb[11].mxu1 }
 0x190   : > { %v5245_v37 = vpop.f32.mrb[12].mxu1 }
 0x191   : > { %v5247_v38 = vpop.f32.mrb[13].mxu1 }
 0x192   : > { %v5249_v39 = vpop.f32.mrb[14].mxu1 }
 0x193   : > { %v5251_v40 = vpop.f32.mrb[15].mxu1 }
 0x199   : > { %v4179_v41 = vpop.f32.mrb[0].mxu0 }
 0x19a   : > { %v4217_v43 = vadd.f32 %v4179_v41, %v4019_v25  ;;  %v2771_v44 = vpop.f32.mrb[1].mxu0 }
 0x19b   : > { %v4218_v45 = vadd.f32 %v2771_v44, %v1217_v26  ;;  %v4180_v46 = vpop.f32.mrb[2].mxu0 }
 0x19c   : > { %v2939_v47 = vadd.f32 %v4217_v43, %v5256_v42  ;;  %v4219_v48 = vadd.f32 %v4180_v46, %v4020_v27  ;;  %v2774_v49 = vpop.f32.mrb[3].mxu0 }
 0x19d   : > { %v2937_v50 = vadd.f32 %v4218_v45, %v5256_v42  ;;  %v4220_v5 = vadd.f32 %v2774_v49, %v1220_v28 }
 0x19e   : > { %v2940_v51 = vadd.f32 %v4219_v48, %v5256_v42  ;;  %v2971_v53 = vmax.f32 %v2939_v47, 0.0 }
 0x19f   : > { %v2938_v52 = vadd.f32 %v4220_v5, %v5256_v42  ;;  %v2969_v7 = vmax.f32 %v2937_v50, 0.0 }
 0x1a0   : > { %v2972_v54 = vmax.f32 %v2940_v51, 0.0 }
 0x1a1   : > { %v2970_v55 = vmax.f32 %v2938_v52, 0.0  ;;  %v4183_v56 = vpop.f32.mrb[4].mxu0 }
 0x1a2   : > { %v3702_v12 = vpack.c.bf16 %v2972_v54, %v2971_v53  ;;  %v4221_v57 = vadd.f32 %v4183_v56, %v4023_v29  ;;  %v2787_v58 = vpop.f32.mrb[5].mxu0 }
 0x1a3   : > { %v3697_v59 = vpack.c.bf16 %v2970_v55, %v2969_v7  ;;  %v4222_v60 = vadd.f32 %v2787_v58, %v1233_v30  ;;  %v4184_v61 = vpop.f32.mrb[6].mxu0 }
 0x1a4   : > { %3774 = vst [vmem:[%s5265_s30 + $0x8] sm:$0xff] %v3702_v12   ;;  %v2943_v62 = vadd.f32 %v4221_v57, %v5256_v42  ;;  %v4223_v63 = vadd.f32 %v4184_v61, %v4024_v31  ;;  %v2790_v0 = vpop.f32.mrb[7].mxu0 }
 0x1a5   : > { %3698 = vst [vmem:[%s5265_s30] sm:$0xff] %v3697_v59   ;;  %v2941_v2 = vadd.f32 %v4222_v60, %v5256_v42  ;;  %v4224_v3 = vadd.f32 %v2790_v0, %v1236_v32 }
 0x1a6   : > { %v2944_v4 = vadd.f32 %v4223_v63, %v5256_v42  ;;  %v2975_v8 = vmax.f32 %v2943_v62, 0.0 }
 0x1a7   : > { %v2942_v6 = vadd.f32 %v4224_v3, %v5256_v42  ;;  %v2973_v10 = vmax.f32 %v2941_v2, 0.0 }
 0x1a8   : > { %v2976_v9 = vmax.f32 %v2944_v4, 0.0 }
 0x1a9   : > { %v2974_v11 = vmax.f32 %v2942_v6, 0.0  ;;  %v4187_v13 = vpop.f32.mrb[8].mxu0 }
 0x1aa   : > { %v3712_v14 = vpack.c.bf16 %v2976_v9, %v2975_v8  ;;  %v4225_v15 = vadd.f32 %v4187_v13, %v4027_v33  ;;  %v2803_v16 = vpop.f32.mrb[9].mxu0 }
 0x1ab   : > { %v3707_v17 = vpack.c.bf16 %v2974_v11, %v2973_v10  ;;  %v4226_v18 = vadd.f32 %v2803_v16, %v1249_v34  ;;  %v4188_v19 = vpop.f32.mrb[10].mxu0 }
 0x1ac   : > { %3776 = vst [vmem:[%s5265_s30 + $0x18] sm:$0xff] %v3712_v14   ;;  %v2947_v20 = vadd.f32 %v4225_v15, %v5256_v42  ;;  %v4227_v1 = vadd.f32 %v4188_v19, %v4028_v35  ;;  %v2806_v21 = vpop.f32.mrb[11].mxu0 }
 0x1ad   : > { %3775 = vst [vmem:[%s5265_s30 + $0x10] sm:$0xff] %v3707_v17   ;;  %v2945_v22 = vadd.f32 %v4226_v18, %v5256_v42  ;;  %v4228_v23 = vadd.f32 %v2806_v21, %v1252_v36 }
 0x1ae   : > { %v2948_v24 = vadd.f32 %v4227_v1, %v5256_v42  ;;  %v2979_v26 = vmax.f32 %v2947_v20, 0.0 }
 0x1af   : > { %v2946_v25 = vadd.f32 %v4228_v23, %v5256_v42  ;;  %v2977_v28 = vmax.f32 %v2945_v22, 0.0 }
 0x1b0   : > { %v2980_v27 = vmax.f32 %v2948_v24, 0.0 }
 0x1b1   : > { %v2978_v29 = vmax.f32 %v2946_v25, 0.0  ;;  %v4191_v30 = vpop.f32.mrb[12].mxu0 }
 0x1b2   : > { %v3722_v31 = vpack.c.bf16 %v2980_v27, %v2979_v26  ;;  %v4229_v32 = vadd.f32 %v4191_v30, %v5245_v37  ;;  %v2819_v33 = vpop.f32.mrb[13].mxu0 }
 0x1b3   : > { %v3717_v34 = vpack.c.bf16 %v2978_v29, %v2977_v28  ;;  %v4230_v35 = vadd.f32 %v2819_v33, %v5247_v38  ;;  %v4192_v41 = vpop.f32.mrb[14].mxu0 }
 0x1b4   : > { %3778 = vst [vmem:[%s5265_s30 + $0x28] sm:$0xff] %v3722_v31   ;;  %v2951_v36 = vadd.f32 %v4229_v32, %v5256_v42  ;;  %v4231_v43 = vadd.f32 %v4192_v41, %v5249_v39  ;;  %v2822_v44 = vpop.f32.mrb[15].mxu0 }
 0x1b5   : > { %3777 = vst [vmem:[%s5265_s30 + $0x20] sm:$0xff] %v3717_v34   ;;  %v2949_v45 = vadd.f32 %v4230_v35, %v5256_v42  ;;  %v4232_v46 = vadd.f32 %v2822_v44, %v5251_v40 }
 0x1b6   : > { %v2952_v47 = vadd.f32 %v4231_v43, %v5256_v42  ;;  %v2983_v48 = vmax.f32 %v2951_v36, 0.0 }
 0x1b7   : > { %v2950_v37 = vadd.f32 %v4232_v46, %v5256_v42  ;;  %v2981_v50 = vmax.f32 %v2949_v45, 0.0 }
 0x1b8   : > { %v2984_v49 = vmax.f32 %v2952_v47, 0.0  ;;  %v4075_v38 = vpop.f32.mrb[16].mxu1 }
 0x1b9   : > { %v2982_v5 = vmax.f32 %v2950_v37, 0.0  ;;  %v4195_v51 = vpop.f32.mrb[16].mxu0  ;;  %v1668_v52 = vpop.f32.mrb[17].mxu1 }
 0x1ba   : > { %v3732_v39 = vpack.c.bf16 %v2984_v49, %v2983_v48  ;;  %v4233_v53 = vadd.f32 %v4195_v51, %v4075_v38  ;;  %v2835_v54 = vpop.f32.mrb[17].mxu0  ;;  %v4076_v7 = vpop.f32.mrb[18].mxu1 }
 0x1bb   : > { %v3727_v55 = vpack.c.bf16 %v2982_v5, %v2981_v50  ;;  %v4234_v56 = vadd.f32 %v2835_v54, %v1668_v52  ;;  %v4196_v40 = vpop.f32.mrb[18].mxu0  ;;  %v1671_v12 = vpop.f32.mrb[19].mxu1 }
 0x1bc   : > { %3780 = vst [vmem:[%s5265_s30 + $0x38] sm:$0xff] %v3732_v39   ;;  %v2955_v57 = vadd.f32 %v4233_v53, %v5256_v42  ;;  %v4235_v58 = vadd.f32 %v4196_v40, %v4076_v7  ;;  %v2838_v59 = vpop.f32.mrb[19].mxu0 }
 0x1bd   : > { %3779 = vst [vmem:[%s5265_s30 + $0x30] sm:$0xff] %v3727_v55   ;;  %v2953_v60 = vadd.f32 %v4234_v56, %v5256_v42  ;;  %v4236_v61 = vadd.f32 %v2838_v59, %v1671_v12 }
 0x1be   : > { %v2956_v62 = vadd.f32 %v4235_v58, %v5256_v42  ;;  %v2987_v0 = vmax.f32 %v2955_v57, 0.0 }
 0x1bf   : > { %v2954_v63 = vadd.f32 %v4236_v61, %v5256_v42  ;;  %v2985_v4 = vmax.f32 %v2953_v60, 0.0 }
 0x1c0   : > { %v2988_v2 = vmax.f32 %v2956_v62, 0.0  ;;  %v4079_v3 = vpop.f32.mrb[20].mxu1 }
 0x1c1   : > { %v2986_v6 = vmax.f32 %v2954_v63, 0.0  ;;  %v4199_v8 = vpop.f32.mrb[20].mxu0  ;;  %v1684_v9 = vpop.f32.mrb[21].mxu1 }
 0x1c2   : > { %v3742_v10 = vpack.c.bf16 %v2988_v2, %v2987_v0  ;;  %v4237_v11 = vadd.f32 %v4199_v8, %v4079_v3  ;;  %v2851_v13 = vpop.f32.mrb[21].mxu0  ;;  %v4080_v14 = vpop.f32.mrb[22].mxu1 }
 0x1c3   : > { %v3737_v15 = vpack.c.bf16 %v2986_v6, %v2985_v4  ;;  %v4238_v16 = vadd.f32 %v2851_v13, %v1684_v9  ;;  %v4200_v17 = vpop.f32.mrb[22].mxu0  ;;  %v1687_v18 = vpop.f32.mrb[23].mxu1 }
 0x1c4   : > { %3782 = vst [vmem:[%s5265_s30 + $0x48] sm:$0xff] %v3742_v10   ;;  %v2959_v19 = vadd.f32 %v4237_v11, %v5256_v42  ;;  %v4239_v20 = vadd.f32 %v4200_v17, %v4080_v14  ;;  %v2854_v1 = vpop.f32.mrb[23].mxu0 }
 0x1c5   : > { %3781 = vst [vmem:[%s5265_s30 + $0x40] sm:$0xff] %v3737_v15   ;;  %v2957_v21 = vadd.f32 %v4238_v16, %v5256_v42  ;;  %v4240_v22 = vadd.f32 %v2854_v1, %v1687_v18 }
 0x1c6   : > { %v2960_v23 = vadd.f32 %v4239_v20, %v5256_v42  ;;  %v2991_v25 = vmax.f32 %v2959_v19, 0.0 }
 0x1c7   : > { %v2958_v24 = vadd.f32 %v4240_v22, %v5256_v42  ;;  %v2989_v28 = vmax.f32 %v2957_v21, 0.0 }
 0x1c8   : > { %v2992_v26 = vmax.f32 %v2960_v23, 0.0  ;;  %v4083_v27 = vpop.f32.mrb[24].mxu1 }
 0x1c9   : > { %v2990_v29 = vmax.f32 %v2958_v24, 0.0  ;;  %v4203_v30 = vpop.f32.mrb[24].mxu0  ;;  %v1700_v31 = vpop.f32.mrb[25].mxu1 }
 0x1ca   : > { %v3752_v32 = vpack.c.bf16 %v2992_v26, %v2991_v25  ;;  %v4241_v33 = vadd.f32 %v4203_v30, %v4083_v27  ;;  %v2867_v34 = vpop.f32.mrb[25].mxu0  ;;  %v4084_v35 = vpop.f32.mrb[26].mxu1 }
 0x1cb   : > { %v3747_v41 = vpack.c.bf16 %v2990_v29, %v2989_v28  ;;  %v4242_v36 = vadd.f32 %v2867_v34, %v1700_v31  ;;  %v4204_v43 = vpop.f32.mrb[26].mxu0  ;;  %v1703_v44 = vpop.f32.mrb[27].mxu1 }
 0x1cc   : > { %3784 = vst [vmem:[%s5265_s30 + $0x58] sm:$0xff] %v3752_v32   ;;  %v2963_v45 = vadd.f32 %v4241_v33, %v5256_v42  ;;  %v4243_v46 = vadd.f32 %v4204_v43, %v4084_v35  ;;  %v2870_v47 = vpop.f32.mrb[27].mxu0 }
 0x1cd   : > { %3783 = vst [vmem:[%s5265_s30 + $0x50] sm:$0xff] %v3747_v41   ;;  %v2961_v37 = vadd.f32 %v4242_v36, %v5256_v42  ;;  %v4244_v48 = vadd.f32 %v2870_v47, %v1703_v44 }
 0x1ce   : > { %v2964_v49 = vadd.f32 %v4243_v46, %v5256_v42  ;;  %v2995_v50 = vmax.f32 %v2963_v45, 0.0 }
 0x1cf   : > { %v2962_v38 = vadd.f32 %v4244_v48, %v5256_v42  ;;  %v2993_v52 = vmax.f32 %v2961_v37, 0.0 }
 0x1d0   : > { %v2996_v5 = vmax.f32 %v2964_v49, 0.0  ;;  %v4087_v51 = vpop.f32.mrb[28].mxu1 }
 0x1d1   : > { %v2994_v39 = vmax.f32 %v2962_v38, 0.0  ;;  %v4207_v53 = vpop.f32.mrb[28].mxu0  ;;  %v1716_v54 = vpop.f32.mrb[29].mxu1 }
 0x1d2   : > { %v3762_v7 = vpack.c.bf16 %v2996_v5, %v2995_v50  ;;  %v4245_v55 = vadd.f32 %v4207_v53, %v4087_v51  ;;  %v2883_v56 = vpop.f32.mrb[29].mxu0  ;;  %v4088_v40 = vpop.f32.mrb[30].mxu1 }
 0x1d3   : > { %v3757_v12 = vpack.c.bf16 %v2994_v39, %v2993_v52  ;;  %v4246_v57 = vadd.f32 %v2883_v56, %v1716_v54  ;;  %v4208_v58 = vpop.f32.mrb[30].mxu0  ;;  %v1719_v59 = vpop.f32.mrb[31].mxu1 }
 0x1d4   : > { %3786 = vst [vmem:[%s5265_s30 + $0x68] sm:$0xff] %v3762_v7   ;;  %v2967_v60 = vadd.f32 %v4245_v55, %v5256_v42  ;;  %v4247_v61 = vadd.f32 %v4208_v58, %v4088_v40  ;;  %v2886_v62 = vpop.f32.mrb[31].mxu0 }
 0x1d5   : > { %3785 = vst [vmem:[%s5265_s30 + $0x60] sm:$0xff] %v3757_v12   ;;  %v2965_v63 = vadd.f32 %v4246_v57, %v5256_v42  ;;  %v4248_v0 = vadd.f32 %v2886_v62, %v1719_v59 }
 0x1d6   : > { %v2968_v2 = vadd.f32 %v4247_v61, %v5256_v42  ;;  %v2999_v4 = vmax.f32 %v2967_v60, 0.0 }
 0x1d7   : > { %v2966_v3 = vadd.f32 %v4248_v0, %v5256_v42  ;;  %v2997_v8 = vmax.f32 %v2965_v63, 0.0 }
 0x1d8   : > { %v3000_v6 = vmax.f32 %v2968_v2, 0.0 }
 0x1d9   : > { %v2998_v9 = vmax.f32 %v2966_v3, 0.0 }
 0x1da   : > { %v3772_v10 = vpack.c.bf16 %v3000_v6, %v2999_v4 }
 0x1db   : > { %v3767_v11 = vpack.c.bf16 %v2998_v9, %v2997_v8 }
 0x1dc   : > { %3788 = vst [vmem:[%s5265_s30 + $0x78] sm:$0xff] %v3772_v10  }
 0x1dd   : > { %3787 = vst [vmem:[%s5265_s30 + $0x70] sm:$0xff] %v3767_v11  }
 0x1de   : > { %4647 = shalt.err (!%p4644_p6)
}
 0x1df   : > { %s4648_s11 = scalar_lea.hbm %s5319_s12, 2048  ;;  %s4652_s14 = scalar_lea.hbm %s5383_s4, 16384 }
 0x1e0   : > { %p4649_p7 = scmp.ne.s32.totalorder %s5319_s12, %s4648_s11  ;;  %p4653_p11 = scmp.lt.u32.totalorder %s5319_s12, %s5383_s4 }
 0x1e1   : > { %p4654_p12 = scmp.lt.u32.totalorder %s4652_s14, %s4648_s11  ;;  %p4656_p0 = scmp.lt.u32.totalorder %s4648_s11, %s5319_s12 }
 0x1e2   : > { %p4650_p9 = pnand %p4649_p7, %p4809_p3 }
 0x1e3   : > { %p4655_p13 = por %p4654_p12, %p4653_p11 }
 0x1e4   : > { %p4651_p10 = pneg %p4650_p9 }
 0x1e5   : > { %p4657_p1 = por %p4656_p0, %p4655_p13 }
 0x1e7   : > { %p4658_p2 = pnand %p4657_p1, %p4651_p10 }
 0x1e9   : > { %4661 = shalt.err (!%p4658_p2)
}
 0x1ea   : > { %s4731_s1 = smov 64   ;;  %s4732_s26 = smov 4  }
 0x1eb   : > { %4418 = dma.vmem_to_hbm [thread:$0]  (%p4809_p3), %s5321_s19, 2048, %s5319_s12, %s5327_s6, %s4731_s1, %s4731_s1, %s4732_s26  }
 0x1ec PF: > { %p4424_p4 = scmp.ge.s32.totalorder %s4728_s22, 2  ;;  %s3193_s18 = sand.u32 1, %s4700_s15  }
 0x1ed   : > { %s3194_s24 = scalar_lea.sflag [#allocation3], %s3193_s18 }
 0x1ee   : > { %p4421_p5 = pnand %p4424_p4, %p4818_p8 }
 0x1f0   : > { %4695 = dma.done.wait (!%p4421_p5), %s3194_s24, 2048  }
 0x1f1   : > { %4697 = vsyncadd (!%p4421_p5), %s3194_s24, 4294965248  ;;  %s17_s22 = sadd.s32 1, %s4728_s22   ;;  %s5396_s28 = sld [smem:[#allocation5_spill]] }
 0x1f2   : > { %p14_p6 = scmp.ge.s32.totalorder %s17_s22, 10   ;;  %s5397_s9 = sld [smem:[#allocation6_spill]] }
 0x1f3   : > { %s5398_s15 = smov %s4704_s16  ;;  %s5399_s16 = smov %s4708_s17 }
 0x1f4   : > { %s5400_s17 = smov %s4827_s7  ;;  %s5401_s18 = smov %s4720_s20 }
 0x1f5   : > { %s5402_s19 = smov %s4724_s21  ;;  %16 = sbr.rel (!%p14_p6) target bundleno = 7 (0x7), region = 93 }
 0x1f7   : > { %s5403_s20 = smov %s5396_s28 }
 0x1f8   : > { %s5404_s21 = smov %s5397_s9 }
 0x1fc   :  { %3199 = vsyncpa [#allocation3], 1 }
 0x1fd   :  { %3201 = vsyncpa [#allocation3 + $0x1], 1 }

</bundles_post_ra>
